<compile_context>
chip_gen: v7x
topology: tpu7x:2x2x1
jax: 0.10.0
libtpu: 0.0.40
codegen_flags: <defaults>
</compile_context>

<pallas_src>
import math
import jax
import jax.numpy as jnp
from jax.experimental import pallas as pl
from jax.experimental.pallas import tpu as pltpu

NUM_HEADS = 2
LN_EPS = 1e-5


def _make_kernel(L1, L2, H, dh, hidden, approx_recip):
    scale = 1.0 / math.sqrt(dh)
    Lsum = L1 + L2

    def kernel(x_ref, wqkv_ref, wc_ref, bqkv_ref, lnvec_ref, outvec_ref,
               out_ref, qkv_ref, oslab_ref):
        rows, E = x_ref.shape            # rows = BB * (L1 + L2)
        BB = rows // Lsum
        md = qkv_ref.dtype               # MXU operand dtype (bf16 or f32)

        # ---- shared LayerNorm over the concatenated x1|x2 row slab (f32) ----
        gamma = lnvec_ref[0:1, :]        # (1, E)
        beta = lnvec_ref[1:2, :]
        x = x_ref[...].astype(jnp.float32)
        mu = jnp.mean(x, axis=-1, keepdims=True)
        xc = x - mu
        var = jnp.mean(xc * xc, axis=-1, keepdims=True)
        xt = xc * jax.lax.rsqrt(var + LN_EPS) * gamma + beta

        # ---- fused Q|K|V projection: ONE matmul with N = 3E ----
        qkv = jnp.dot(xt.astype(md), wqkv_ref[...],
                      preferred_element_type=jnp.float32) + bqkv_ref[...]
        qkv_ref[...] = qkv.reshape(BB, Lsum, 3 * E).astype(md)

        # ---- per-head attention, batched over the BB batch rows ----
        for h in range(H):               # H == 2, static
            lo = h * dh
            qh = qkv_ref[:, 0:L1, lo:lo + dh]                       # (BB, L1, dh)
            kh = qkv_ref[:, L1:Lsum, E + lo:E + lo + dh]            # (BB, L2, dh)
            vh = qkv_ref[:, L1:Lsum, 2 * E + lo:2 * E + lo + dh]    # (BB, L2, dh)

            s = jnp.einsum("bqd,bkd->bqk", qh, kh,
                           preferred_element_type=jnp.float32) * scale
            s = s - jnp.max(s, axis=-1, keepdims=True)
            p = jnp.exp(s)
            denom = jnp.sum(p, axis=-1, keepdims=True)
            if approx_recip:
                p = p * pl.reciprocal(denom, approx=True)   # EUP slot, ~free
            else:
                p = p / denom                                # exact path
            oh = jnp.einsum("bqk,bkd->bqd", p.astype(md), vh,
                            preferred_element_type=jnp.float32)
            oslab_ref[:, :, lo:lo + dh] = oh.astype(md)

        # ---- fused out_proj + fc, N padded to Hp lanes (lane-dense stores) ----
        o2 = oslab_ref[...].reshape(BB * L1, E)
        g2 = outvec_ref[0:1, :]
        b2 = outvec_ref[1:2, :]
        bcmb = outvec_ref[2:3, :]
        msk = outvec_ref[3:4, :]         # 1 for real columns, 0 for padding
        y = jnp.dot(o2, wc_ref[...], preferred_element_type=jnp.float32) + bcmb

        # residual LayerNorm over the first `hidden` lanes (padding stays 0:
        # padded weight/bias/gamma/beta columns are all zero).
        inv_n = 1.0 / hidden
        mu2 = jnp.sum(y, axis=-1, keepdims=True) * inv_n
        yc = (y - mu2) * msk
        var2 = jnp.sum(yc * yc, axis=-1, keepdims=True) * inv_n
        normed = yc * jax.lax.rsqrt(var2 + LN_EPS) * g2 + b2
        out_ref[...] = (y + normed).astype(out_ref.dtype)

    return kernel


def cross_modal_attention(x1, x2, params, *, batch_block=None,
                          matmul_dtype=jnp.bfloat16, approx_recip=True):
    B, L1, E = x1.shape
    Bv, L2, Ev = x2.shape
    assert B == Bv and E == Ev, "x1/x2 must share batch and embed dims"
    H = NUM_HEADS
    assert E % H == 0
    dh = E // H
    hidden = params["fc_w"].shape[0]
    assert hidden == E, ("residual add with LayerNorm(input_dim) requires "
                         "hidden_dim == input_dim")
    Hp = ((hidden + 127) // 128) * 128   # lane-dense (unmasked-store) output width
    Lsum = L1 + L2
    f32 = jnp.float32

    # --- batch tiling: >= 2 grid steps so input/output DMAs pipeline behind
    #     compute and v7x's two TensorCores both get work ("parallel" axis). ---
    if batch_block is None:
        batch_block = max(1, B // 4)
        while B % batch_block:
            batch_block -= 1
    assert B % batch_block == 0
    BB = batch_block
    grid = (B // BB,)

    # ---------------- host-side weight fusion / packing ----------------
    wq, wk, wv = jnp.split(params["in_proj_w"], 3, axis=0)        # (E, E) each
    bq, bk, bv = jnp.split(params["in_proj_b"], 3)                # (E,) each
    # packed, pre-transposed Q|K|V projection: a single matmul with N = 3E.
    w_qkv = jnp.concatenate([wq.T, wk.T, wv.T], axis=1).astype(matmul_dtype)
    b_qkv = jnp.concatenate([bq, bk, bv]).reshape(1, 3 * E).astype(f32)

    # fused out_proj + fc:  y = o @ (Wo.T @ Wfc.T) + (bo @ Wfc.T + bfc),
    # zero-padded on N to Hp lanes so stores are full-lane.
    w_comb = params["out_proj_w"].T @ params["fc_w"].T            # (E, hidden)
    b_comb = params["out_proj_b"] @ params["fc_w"].T + params["fc_b"]
    w_comb_p = jnp.zeros((E, Hp), f32).at[:, :hidden].set(w_comb).astype(matmul_dtype)

    def pad_h(v):
        return jnp.zeros((Hp,), f32).at[:hidden].set(v.astype(f32))

    ln_vec = jnp.stack([params["ln_gamma"], params["ln_beta"]]).astype(f32)   # (2, E)
    out_vec = jnp.stack([pad_h(params["ln_gamma"]), pad_h(params["ln_beta"]),
                         pad_h(b_comb),
                         (jnp.arange(Hp) < hidden).astype(f32)])              # (4, Hp)

    # x1 and x2 share the LayerNorm and the QKV projection: concatenate along
    # the sequence axis per batch element and flatten to a 2-D row slab.
    xcat = jnp.concatenate([x1, x2], axis=1).reshape(B * Lsum, E)

    weights = (w_qkv, w_comb_p, b_qkv, ln_vec, out_vec)

    # --- explicit VMEM budget (v7x: 64 MiB physical; v5e default scoped 16 MiB) ---
    md_b = jnp.dtype(matmul_dtype).itemsize
    io_b = jnp.dtype(x1.dtype).itemsize
    est = (2 * BB * Lsum * E * io_b                     # xcat block, double-buffered
           + 2 * BB * L1 * Hp * io_b                    # out block, double-buffered
           + 2 * sum(int(w.size) * w.dtype.itemsize for w in weights)
           + (BB * Lsum * 3 * E + BB * L1 * E) * md_b)  # VMEM scratch
    vmem_limit = int(min(max(4 * est, 32 * 2 ** 20), 48 * 2 ** 20))

    kernel = _make_kernel(L1, L2, H, dh, hidden, approx_recip)

    def build(single_buffer_weights):
        def const_spec(shape):
            nd = len(shape)
            imap = lambda i, _nd=nd: (0,) * _nd
            if single_buffer_weights:
                # constant block index -> no point double-buffering the weights
                return pl.BlockSpec(shape, imap, pipeline_mode=pl.Buffered(1))
            return pl.BlockSpec(shape, imap)

        in_specs = [pl.BlockSpec((BB * Lsum, E), lambda i: (i, 0))]
        in_specs += [const_spec(w.shape) for w in weights]

        return pl.pallas_call(
            kernel,
            out_shape=jax.ShapeDtypeStruct((B * L1, Hp), x1.dtype),
            grid_spec=pltpu.PrefetchScalarGridSpec(
                num_scalar_prefetch=0,
                grid=grid,
                in_specs=in_specs,
                out_specs=pl.BlockSpec((BB * L1, Hp), lambda i: (i, 0)),
                scratch_shapes=[
                    pltpu.VMEM((BB, Lsum, 3 * E), matmul_dtype),   # Q|K|V slab
                    pltpu.VMEM((BB, L1, E), matmul_dtype),         # attn o-slab
                ]),
            compiler_params=pltpu.CompilerParams(
                dimension_semantics=("parallel",),
                vmem_limit_bytes=vmem_limit),
        )

    try:
        out = build(True)(xcat, *weights)
    except Exception:
        # pipeline_mode=pl.Buffered(1) not supported by this JAX build:
        # fall back to default double-buffered weight pipelining.
        out = build(False)(xcat, *weights)

    return out[:, :hidden].reshape(B, L1, hidden)


def _reference(x1, x2, params):
    """Pure-JAX reference mirroring the PyTorch forward."""
    g, b = params["ln_gamma"], params["ln_beta"]

    def ln(x):
        mu = jnp.mean(x, -1, keepdims=True)
        var = jnp.mean((x - mu) ** 2, -1, keepdims=True)
        return (x - mu) / jnp.sqrt(var + LN_EPS) * g + b

    x1t, x2t = ln(x1), ln(x2)
    wq, wk, wv = jnp.split(params["in_proj_w"], 3, axis=0)
    bq, bk, bv = jnp.split(params["in_proj_b"], 3)
    q = x1t @ wq.T + bq
    k = x2t @ wk.T + bk
    v = x2t @ wv.T + bv
    B, L1, E = q.shape
    L2 = k.shape[1]
    dh = E // NUM_HEADS
    qh = q.reshape(B, L1, NUM_HEADS, dh).transpose(0, 2, 1, 3)
    kh = k.reshape(B, L2, NUM_HEADS, dh).transpose(0, 2, 1, 3)
    vh = v.reshape(B, L2, NUM_HEADS, dh).transpose(0, 2, 1, 3)
    s = jnp.einsum("bhqd,bhkd->bhqk", qh, kh) / math.sqrt(dh)
    p = jax.nn.softmax(s, axis=-1)
    o = jnp.einsum("bhqk,bhkd->bhqd", p, vh).transpose(0, 2, 1, 3).reshape(B, L1, E)
    attn_out = o @ params["out_proj_w"].T + params["out_proj_b"]
    y = attn_out @ params["fc_w"].T + params["fc_b"]
    return y + ln(y)


if __name__ == "__main__":
    B, L1, L2, E = 2, 8, 8, 32
    hidden = E   # must equal input_dim for `output + self.norm(output)`

    key = jax.random.PRNGKey(0)
    ks = jax.random.split(key, 10)
    params = {
        "ln_gamma":   1.0 + 0.1 * jax.random.normal(ks[0], (E,), jnp.float32),
        "ln_beta":    0.1 * jax.random.normal(ks[1], (E,), jnp.float32),
        "in_proj_w":  0.1 * jax.random.normal(ks[2], (3 * E, E), jnp.float32),
        "in_proj_b":  0.1 * jax.random.normal(ks[3], (3 * E,), jnp.float32),
        "out_proj_w": 0.1 * jax.random.normal(ks[4], (E, E), jnp.float32),
        "out_proj_b": 0.1 * jax.random.normal(ks[5], (E,), jnp.float32),
        "fc_w":       0.1 * jax.random.normal(ks[6], (hidden, E), jnp.float32),
        "fc_b":       0.1 * jax.random.normal(ks[7], (hidden,), jnp.float32),
    }
    x1 = jax.random.normal(ks[8], (B, L1, E), jnp.float32)
    x2 = jax.random.normal(ks[9], (B, L2, E), jnp.float32)

    ref = _reference(x1, x2, params)

    # Production path: bf16 MXU operands, approximate softmax reciprocal.
    out_bf16 = jax.block_until_ready(cross_modal_attention(x1, x2, params))
    assert out_bf16.shape == (B, L1, hidden)
    assert bool(jnp.all(jnp.isfinite(out_bf16)))
    # bf16 operand rounding is amplified by the residual LayerNorm's 1/std;
    # loose sanity bound here, strict numerics verified on the f32 path below.
    assert float(jnp.max(jnp.abs(out_bf16 - ref))) < 0.3

    # Strict-numerics path: f32 MXU operands, exact softmax normalization.
    out_f32 = jax.block_until_ready(
        cross_modal_attention(x1, x2, params,
                              matmul_dtype=jnp.float32, approx_recip=False))
    assert out_f32.shape == (B, L1, hidden)
    assert jnp.allclose(out_f32, ref, rtol=1e-3, atol=1e-3), "mismatch vs JAX reference"

    print("KERNEL_OK")
</pallas_src>

<mosaic_0001>
module attributes {stable_mosaic.version = 11 : i64} {
  func.func @kernel(%arg0: i32, %arg1: memref<16x32xf32, #tpu.memory_space<vmem>>, %arg2: memref<32x96xbf16, #tpu.memory_space<vmem>>, %arg3: memref<32x128xbf16, #tpu.memory_space<vmem>>, %arg4: memref<1x96xf32, #tpu.memory_space<vmem>>, %arg5: memref<2x32xf32, #tpu.memory_space<vmem>>, %arg6: memref<4x128xf32, #tpu.memory_space<vmem>>, %arg7: memref<8x128xf32, #tpu.memory_space<vmem>>, %arg8: memref<1x16x96xbf16, #tpu.memory_space<vmem>>, %arg9: memref<1x8x32xbf16, #tpu.memory_space<vmem>>) attributes {dimension_semantics = [#tpu.dimension_semantics<parallel>], iteration_bounds = array<i64: 2>, scalar_prefetch = 0 : i64, scratch_operands = 2 : i64, tpu.core_type = #tpu.core_type<tc>, window_params = [{transform_indices = @transform_0, window_bounds = array<i64: 16, 32>}, {pipeline_mode = #tpu.pipeline_mode<synchronous>, transform_indices = @transform_1, window_bounds = array<i64: 32, 96>}, {pipeline_mode = #tpu.pipeline_mode<synchronous>, transform_indices = @transform_2, window_bounds = array<i64: 32, 128>}, {pipeline_mode = #tpu.pipeline_mode<synchronous>, transform_indices = @transform_3, window_bounds = array<i64: 1, 96>}, {pipeline_mode = #tpu.pipeline_mode<synchronous>, transform_indices = @transform_4, window_bounds = array<i64: 2, 32>}, {pipeline_mode = #tpu.pipeline_mode<synchronous>, transform_indices = @transform_5, window_bounds = array<i64: 4, 128>}, {transform_indices = @transform_6, window_bounds = array<i64: 8, 128>}]} {
    %c0 = arith.constant 0 : index
    %c0_0 = arith.constant 0 : index
    %0 = vector.load %arg5[%c0, %c0_0] : memref<2x32xf32, #tpu.memory_space<vmem>>, vector<1x32xf32>
    %c1 = arith.constant 1 : index
    %c0_1 = arith.constant 0 : index
    %1 = vector.load %arg5[%c1, %c0_1] : memref<2x32xf32, #tpu.memory_space<vmem>>, vector<1x32xf32>
    %c0_2 = arith.constant 0 : index
    %c0_3 = arith.constant 0 : index
    %2 = vector.load %arg1[%c0_2, %c0_3] : memref<16x32xf32, #tpu.memory_space<vmem>>, vector<16x32xf32>
    %cst = arith.constant dense<0.000000e+00> : vector<16xf32>
    %3 = vector.multi_reduction <add>, %2, %cst [1] : vector<16x32xf32> to vector<16xf32>
    %4 = vector.shape_cast %3 : vector<16xf32> to vector<16x1xf32>
    %cst_4 = arith.constant 3.200000e+01 : f32
    %5 = vector.broadcast %cst_4 : f32 to vector<16x1xf32>
    %6 = arith.divf %4, %5 : vector<16x1xf32>
    %7 = vector.broadcast %6 : vector<16x1xf32> to vector<16x32xf32>
    %8 = arith.subf %2, %7 : vector<16x32xf32>
    %9 = arith.mulf %8, %8 : vector<16x32xf32>
    %cst_5 = arith.constant dense<0.000000e+00> : vector<16xf32>
    %10 = vector.multi_reduction <add>, %9, %cst_5 [1] : vector<16x32xf32> to vector<16xf32>
    %11 = vector.shape_cast %10 : vector<16xf32> to vector<16x1xf32>
    %cst_6 = arith.constant 3.200000e+01 : f32
    %12 = vector.broadcast %cst_6 : f32 to vector<16x1xf32>
    %13 = arith.divf %11, %12 : vector<16x1xf32>
    %cst_7 = arith.constant 9.99999974E-6 : f32
    %14 = vector.broadcast %cst_7 : f32 to vector<16x1xf32>
    %15 = arith.addf %13, %14 : vector<16x1xf32>
    %16 = math.rsqrt %15 : vector<16x1xf32>
    %17 = vector.broadcast %16 : vector<16x1xf32> to vector<16x32xf32>
    %18 = arith.mulf %8, %17 : vector<16x32xf32>
    %19 = vector.broadcast %0 : vector<1x32xf32> to vector<16x32xf32>
    %20 = arith.mulf %18, %19 : vector<16x32xf32>
    %21 = vector.broadcast %1 : vector<1x32xf32> to vector<16x32xf32>
    %22 = arith.addf %20, %21 : vector<16x32xf32>
    %23 = arith.truncf %22 : vector<16x32xf32> to vector<16x32xbf16>
    %c0_8 = arith.constant 0 : index
    %c0_9 = arith.constant 0 : index
    %24 = vector.load %arg2[%c0_8, %c0_9] : memref<32x96xbf16, #tpu.memory_space<vmem>>, vector<32x96xbf16>
    %cst_10 = arith.constant dense<0.000000e+00> : vector<16x96xf32>
    %25 = tpu.matmul %23, %24, %cst_10 {dimension_numbers = #tpu.dot_dimension_numbers<[1], [0], [0], [1], [0, 0, 1, 1], [], []>} : vector<16x32xbf16>, vector<32x96xbf16>, vector<16x96xf32> -> vector<16x96xf32>
    %c0_11 = arith.constant 0 : index
    %c0_12 = arith.constant 0 : index
    %26 = vector.load %arg4[%c0_11, %c0_12] : memref<1x96xf32, #tpu.memory_space<vmem>>, vector<1x96xf32>
    %27 = vector.broadcast %26 : vector<1x96xf32> to vector<16x96xf32>
    %28 = arith.addf %25, %27 : vector<16x96xf32>
    %29 = vector.shape_cast %28 : vector<16x96xf32> to vector<1x16x96xf32>
    %30 = arith.truncf %29 : vector<1x16x96xf32> to vector<1x16x96xbf16>
    %c0_13 = arith.constant 0 : index
    %c0_14 = arith.constant 0 : index
    %c0_15 = arith.constant 0 : index
    %31 = vector.load %arg8[%c0_13, %c0_14, %c0_15] : memref<1x16x96xbf16, #tpu.memory_space<vmem>>, vector<1x16x96xbf16>
    tpu.vector_store %arg8[%c0_13, %c0_14, %c0_15], %30 {strides = array<i32>} : memref<1x16x96xbf16, #tpu.memory_space<vmem>>, vector<1x16x96xbf16>,
    %c0_16 = arith.constant 0 : index
    %c0_17 = arith.constant 0 : index
    %c0_18 = arith.constant 0 : index
    %32 = vector.load %arg8[%c0_16, %c0_17, %c0_18] : memref<1x16x96xbf16, #tpu.memory_space<vmem>>, vector<1x8x16xbf16>
    %c0_19 = arith.constant 0 : index
    %c8 = arith.constant 8 : index
    %c32 = arith.constant 32 : index
    %33 = vector.load %arg8[%c0_19, %c8, %c32] : memref<1x16x96xbf16, #tpu.memory_space<vmem>>, vector<1x8x16xbf16>
    %c0_20 = arith.constant 0 : index
    %c8_21 = arith.constant 8 : index
    %c64 = arith.constant 64 : index
    %34 = vector.load %arg8[%c0_20, %c8_21, %c64] : memref<1x16x96xbf16, #tpu.memory_space<vmem>>, vector<1x8x16xbf16>
    "tpu.trace_start"() <{level = 10 : i32, message = "bqd,bkd->bqk"}> : () -> ()
    %cst_22 = arith.constant dense<0.000000e+00> : vector<1x8x8xf32>
    %35 = tpu.matmul %32, %33, %cst_22 {dimension_numbers = #tpu.dot_dimension_numbers<[2], [2], [1], [1], [0, 0, 0, 1, 1, 1], [0], [0]>} : vector<1x8x16xbf16>, vector<1x8x16xbf16>, vector<1x8x8xf32> -> vector<1x8x8xf32>
    "tpu.trace_stop"() : () -> ()
    %cst_23 = arith.constant 2.500000e-01 : f32
    %36 = vector.broadcast %cst_23 : f32 to vector<1x8x8xf32>
    %37 = arith.mulf %35, %36 : vector<1x8x8xf32>
    %cst_24 = arith.constant dense<0xFF800000> : vector<1x8xf32>
    %38 = vector.multi_reduction <maximumf>, %37, %cst_24 [2] : vector<1x8x8xf32> to vector<1x8xf32>
    %39 = vector.shape_cast %38 : vector<1x8xf32> to vector<1x8x1xf32>
    %40 = vector.broadcast %39 : vector<1x8x1xf32> to vector<1x8x8xf32>
    %41 = arith.subf %37, %40 : vector<1x8x8xf32>
    %42 = math.exp %41 : vector<1x8x8xf32>
    %cst_25 = arith.constant dense<0.000000e+00> : vector<1x8xf32>
    %43 = vector.multi_reduction <add>, %42, %cst_25 [2] : vector<1x8x8xf32> to vector<1x8xf32>
    %44 = vector.shape_cast %43 : vector<1x8xf32> to vector<1x8x1xf32>
    %45 = tpu.reciprocal %44 {approx = true} : vector<1x8x1xf32> -> vector<1x8x1xf32>
    %46 = vector.broadcast %45 : vector<1x8x1xf32> to vector<1x8x8xf32>
    %47 = arith.mulf %42, %46 : vector<1x8x8xf32>
    %48 = arith.truncf %47 : vector<1x8x8xf32> to vector<1x8x8xbf16>
    "tpu.trace_start"() <{level = 10 : i32, message = "bqk,bkd->bqd"}> : () -> ()
    %cst_26 = arith.constant dense<0.000000e+00> : vector<1x8x16xf32>
    %49 = tpu.matmul %48, %34, %cst_26 {dimension_numbers = #tpu.dot_dimension_numbers<[2], [1], [1], [2], [0, 0, 0, 1, 1, 2], [0], [0]>} : vector<1x8x8xbf16>, vector<1x8x16xbf16>, vector<1x8x16xf32> -> vector<1x8x16xf32>
    "tpu.trace_stop"() : () -> ()
    %50 = arith.truncf %49 : vector<1x8x16xf32> to vector<1x8x16xbf16>
    %c0_27 = arith.constant 0 : index
    %c0_28 = arith.constant 0 : index
    %c0_29 = arith.constant 0 : index
    %51 = vector.load %arg9[%c0_27, %c0_28, %c0_29] : memref<1x8x32xbf16, #tpu.memory_space<vmem>>, vector<1x8x16xbf16>
    tpu.vector_store %arg9[%c0_27, %c0_28, %c0_29], %50 {strides = array<i32>} : memref<1x8x32xbf16, #tpu.memory_space<vmem>>, vector<1x8x16xbf16>,
    %c0_30 = arith.constant 0 : index
    %c0_31 = arith.constant 0 : index
    %c16 = arith.constant 16 : index
    %52 = vector.load %arg8[%c0_30, %c0_31, %c16] : memref<1x16x96xbf16, #tpu.memory_space<vmem>>, vector<1x8x16xbf16>
    %c0_32 = arith.constant 0 : index
    %c8_33 = arith.constant 8 : index
    %c48 = arith.constant 48 : index
    %53 = vector.load %arg8[%c0_32, %c8_33, %c48] : memref<1x16x96xbf16, #tpu.memory_space<vmem>>, vector<1x8x16xbf16>
    %c0_34 = arith.constant 0 : index
    %c8_35 = arith.constant 8 : index
    %c80 = arith.constant 80 : index
    %54 = vector.load %arg8[%c0_34, %c8_35, %c80] : memref<1x16x96xbf16, #tpu.memory_space<vmem>>, vector<1x8x16xbf16>
    "tpu.trace_start"() <{level = 10 : i32, message = "bqd,bkd->bqk"}> : () -> ()
    %cst_36 = arith.constant dense<0.000000e+00> : vector<1x8x8xf32>
    %55 = tpu.matmul %52, %53, %cst_36 {dimension_numbers = #tpu.dot_dimension_numbers<[2], [2], [1], [1], [0, 0, 0, 1, 1, 1], [0], [0]>} : vector<1x8x16xbf16>, vector<1x8x16xbf16>, vector<1x8x8xf32> -> vector<1x8x8xf32>
    "tpu.trace_stop"() : () -> ()
    %cst_37 = arith.constant 2.500000e-01 : f32
    %56 = vector.broadcast %cst_37 : f32 to vector<1x8x8xf32>
    %57 = arith.mulf %55, %56 : vector<1x8x8xf32>
    %cst_38 = arith.constant dense<0xFF800000> : vector<1x8xf32>
    %58 = vector.multi_reduction <maximumf>, %57, %cst_38 [2] : vector<1x8x8xf32> to vector<1x8xf32>
    %59 = vector.shape_cast %58 : vector<1x8xf32> to vector<1x8x1xf32>
    %60 = vector.broadcast %59 : vector<1x8x1xf32> to vector<1x8x8xf32>
    %61 = arith.subf %57, %60 : vector<1x8x8xf32>
    %62 = math.exp %61 : vector<1x8x8xf32>
    %cst_39 = arith.constant dense<0.000000e+00> : vector<1x8xf32>
    %63 = vector.multi_reduction <add>, %62, %cst_39 [2] : vector<1x8x8xf32> to vector<1x8xf32>
    %64 = vector.shape_cast %63 : vector<1x8xf32> to vector<1x8x1xf32>
    %65 = tpu.reciprocal %64 {approx = true} : vector<1x8x1xf32> -> vector<1x8x1xf32>
    %66 = vector.broadcast %65 : vector<1x8x1xf32> to vector<1x8x8xf32>
    %67 = arith.mulf %62, %66 : vector<1x8x8xf32>
    %68 = arith.truncf %67 : vector<1x8x8xf32> to vector<1x8x8xbf16>
    "tpu.trace_start"() <{level = 10 : i32, message = "bqk,bkd->bqd"}> : () -> ()
    %cst_40 = arith.constant dense<0.000000e+00> : vector<1x8x16xf32>
    %69 = tpu.matmul %68, %54, %cst_40 {dimension_numbers = #tpu.dot_dimension_numbers<[2], [1], [1], [2], [0, 0, 0, 1, 1, 2], [0], [0]>} : vector<1x8x8xbf16>, vector<1x8x16xbf16>, vector<1x8x16xf32> -> vector<1x8x16xf32>
    "tpu.trace_stop"() : () -> ()
    %70 = arith.truncf %69 : vector<1x8x16xf32> to vector<1x8x16xbf16>
    %c0_41 = arith.constant 0 : index
    %c0_42 = arith.constant 0 : index
    %c16_43 = arith.constant 16 : index
    %71 = vector.load %arg9[%c0_41, %c0_42, %c16_43] : memref<1x8x32xbf16, #tpu.memory_space<vmem>>, vector<1x8x16xbf16>
    tpu.vector_store %arg9[%c0_41, %c0_42, %c16_43], %70 {strides = array<i32>} : memref<1x8x32xbf16, #tpu.memory_space<vmem>>, vector<1x8x16xbf16>,
    %c0_44 = arith.constant 0 : index
    %c0_45 = arith.constant 0 : index
    %c0_46 = arith.constant 0 : index
    %72 = vector.load %arg9[%c0_44, %c0_45, %c0_46] : memref<1x8x32xbf16, #tpu.memory_space<vmem>>, vector<1x8x32xbf16>
    %73 = vector.shape_cast %72 : vector<1x8x32xbf16> to vector<8x32xbf16>
    %c0_47 = arith.constant 0 : index
    %c0_48 = arith.constant 0 : index
    %74 = vector.load %arg6[%c0_47, %c0_48] : memref<4x128xf32, #tpu.memory_space<vmem>>, vector<1x128xf32>
    %c1_49 = arith.constant 1 : index
    %c0_50 = arith.constant 0 : index
    %75 = vector.load %arg6[%c1_49, %c0_50] : memref<4x128xf32, #tpu.memory_space<vmem>>, vector<1x128xf32>
    %c2 = arith.constant 2 : index
    %c0_51 = arith.constant 0 : index
    %76 = vector.load %arg6[%c2, %c0_51] : memref<4x128xf32, #tpu.memory_space<vmem>>, vector<1x128xf32>
    %c3 = arith.constant 3 : index
    %c0_52 = arith.constant 0 : index
    %77 = vector.load %arg6[%c3, %c0_52] : memref<4x128xf32, #tpu.memory_space<vmem>>, vector<1x128xf32>
    %c0_53 = arith.constant 0 : index
    %c0_54 = arith.constant 0 : index
    %78 = vector.load %arg3[%c0_53, %c0_54] : memref<32x128xbf16, #tpu.memory_space<vmem>>, vector<32x128xbf16>
    %cst_55 = arith.constant dense<0.000000e+00> : vector<8x128xf32>
    %79 = tpu.matmul %73, %78, %cst_55 {dimension_numbers = #tpu.dot_dimension_numbers<[1], [0], [0], [1], [0, 0, 1, 1], [], []>} : vector<8x32xbf16>, vector<32x128xbf16>, vector<8x128xf32> -> vector<8x128xf32>
    %80 = vector.broadcast %76 : vector<1x128xf32> to vector<8x128xf32>
    %81 = arith.addf %79, %80 : vector<8x128xf32>
    %cst_56 = arith.constant dense<0.000000e+00> : vector<8xf32>
    %82 = vector.multi_reduction <add>, %81, %cst_56 [1] : vector<8x128xf32> to vector<8xf32>
    %83 = vector.shape_cast %82 : vector<8xf32> to vector<8x1xf32>
    %cst_57 = arith.constant 3.125000e-02 : f32
    %84 = vector.broadcast %cst_57 : f32 to vector<8x1xf32>
    %85 = arith.mulf %83, %84 : vector<8x1xf32>
    %86 = vector.broadcast %85 : vector<8x1xf32> to vector<8x128xf32>
    %87 = arith.subf %81, %86 : vector<8x128xf32>
    %88 = vector.broadcast %77 : vector<1x128xf32> to vector<8x128xf32>
    %89 = arith.mulf %87, %88 : vector<8x128xf32>
    %90 = arith.mulf %89, %89 : vector<8x128xf32>
    %cst_58 = arith.constant dense<0.000000e+00> : vector<8xf32>
    %91 = vector.multi_reduction <add>, %90, %cst_58 [1] : vector<8x128xf32> to vector<8xf32>
    %92 = vector.shape_cast %91 : vector<8xf32> to vector<8x1xf32>
    %cst_59 = arith.constant 3.125000e-02 : f32
    %93 = vector.broadcast %cst_59 : f32 to vector<8x1xf32>
    %94 = arith.mulf %92, %93 : vector<8x1xf32>
    %cst_60 = arith.constant 9.99999974E-6 : f32
    %95 = vector.broadcast %cst_60 : f32 to vector<8x1xf32>
    %96 = arith.addf %94, %95 : vector<8x1xf32>
    %97 = math.rsqrt %96 : vector<8x1xf32>
    %98 = vector.broadcast %97 : vector<8x1xf32> to vector<8x128xf32>
    %99 = arith.mulf %89, %98 : vector<8x128xf32>
    %100 = vector.broadcast %74 : vector<1x128xf32> to vector<8x128xf32>
    %101 = arith.mulf %99, %100 : vector<8x128xf32>
    %102 = vector.broadcast %75 : vector<1x128xf32> to vector<8x128xf32>
    %103 = arith.addf %101, %102 : vector<8x128xf32>
    %104 = arith.addf %81, %103 : vector<8x128xf32>
    %c0_61 = arith.constant 0 : index
    %c0_62 = arith.constant 0 : index
    %105 = vector.load %arg7[%c0_61, %c0_62] : memref<8x128xf32, #tpu.memory_space<vmem>>, vector<8x128xf32>
    tpu.vector_store %arg7[%c0_61, %c0_62], %104 {strides = array<i32>} : memref<8x128xf32, #tpu.memory_space<vmem>>, vector<8x128xf32>,
    return
  }
  func.func @transform_0(%arg0: i32) -> (i32, i32) {
    %c0_i32 = arith.constant 0 : i32
    %c0_i32_0 = arith.constant 0 : i32
    return %arg0, %c0_i32 : i32, i32
  }
  func.func @transform_1(%arg0: i32) -> (i32, i32) {
    %c0_i32 = arith.constant 0 : i32
    %c0_i32_0 = arith.constant 0 : i32
    %c0_i32_1 = arith.constant 0 : i32
    return %c0_i32, %c0_i32_0 : i32, i32
  }
  func.func @transform_2(%arg0: i32) -> (i32, i32) {
    %c0_i32 = arith.constant 0 : i32
    %c0_i32_0 = arith.constant 0 : i32
    %c0_i32_1 = arith.constant 0 : i32
    return %c0_i32, %c0_i32_0 : i32, i32
  }
  func.func @transform_3(%arg0: i32) -> (i32, i32) {
    %c0_i32 = arith.constant 0 : i32
    %c0_i32_0 = arith.constant 0 : i32
    %c0_i32_1 = arith.constant 0 : i32
    return %c0_i32, %c0_i32_0 : i32, i32
  }
  func.func @transform_4(%arg0: i32) -> (i32, i32) {
    %c0_i32 = arith.constant 0 : i32
    %c0_i32_0 = arith.constant 0 : i32
    %c0_i32_1 = arith.constant 0 : i32
    return %c0_i32, %c0_i32_0 : i32, i32
  }
  func.func @transform_5(%arg0: i32) -> (i32, i32) {
    %c0_i32 = arith.constant 0 : i32
    %c0_i32_0 = arith.constant 0 : i32
    %c0_i32_1 = arith.constant 0 : i32
    return %c0_i32, %c0_i32_0 : i32, i32
  }
  func.func @transform_6(%arg0: i32) -> (i32, i32) {
    %c0_i32 = arith.constant 0 : i32
    %c0_i32_0 = arith.constant 0 : i32
    return %arg0, %c0_i32 : i32, i32
  }
}

module attributes {stable_mosaic.version = 11 : i64} {
  func.func @kernel(%arg0: i32, %arg1: memref<16x32xf32, #tpu.memory_space<vmem>>, %arg2: memref<32x96xbf16, #tpu.memory_space<vmem>>, %arg3: memref<32x128xbf16, #tpu.memory_space<vmem>>, %arg4: memref<1x96xf32, #tpu.memory_space<vmem>>, %arg5: memref<2x32xf32, #tpu.memory_space<vmem>>, %arg6: memref<4x128xf32, #tpu.memory_space<vmem>>, %arg7: memref<8x128xf32, #tpu.memory_space<vmem>>, %arg8: memref<1x16x96xbf16, #tpu.memory_space<vmem>>, %arg9: memref<1x8x32xbf16, #tpu.memory_space<vmem>>) attributes {dimension_semantics = [#tpu.dimension_semantics<parallel>], iteration_bounds = array<i64: 2>, scalar_prefetch = 0 : i64, scratch_operands = 2 : i64, tpu.core_type = #tpu.core_type<tc>, window_params = [{transform_indices = @transform_0, window_bounds = array<i64: 16, 32>}, {pipeline_mode = #tpu.pipeline_mode<synchronous>, transform_indices = @transform_1, window_bounds = array<i64: 32, 96>}, {pipeline_mode = #tpu.pipeline_mode<synchronous>, transform_indices = @transform_2, window_bounds = array<i64: 32, 128>}, {pipeline_mode = #tpu.pipeline_mode<synchronous>, transform_indices = @transform_3, window_bounds = array<i64: 1, 96>}, {pipeline_mode = #tpu.pipeline_mode<synchronous>, transform_indices = @transform_4, window_bounds = array<i64: 2, 32>}, {pipeline_mode = #tpu.pipeline_mode<synchronous>, transform_indices = @transform_5, window_bounds = array<i64: 4, 128>}, {transform_indices = @transform_6, window_bounds = array<i64: 8, 128>}]} {
    %c0 = arith.constant 0 : index
    %c0_0 = arith.constant 0 : index
    %0 = vector.load %arg5[%c0, %c0_0] : memref<2x32xf32, #tpu.memory_space<vmem>>, vector<1x32xf32>
    %c1 = arith.constant 1 : index
    %c0_1 = arith.constant 0 : index
    %1 = vector.load %arg5[%c1, %c0_1] : memref<2x32xf32, #tpu.memory_space<vmem>>, vector<1x32xf32>
    %c0_2 = arith.constant 0 : index
    %c0_3 = arith.constant 0 : index
    %2 = vector.load %arg1[%c0_2, %c0_3] : memref<16x32xf32, #tpu.memory_space<vmem>>, vector<16x32xf32>
    %cst = arith.constant dense<0.000000e+00> : vector<16xf32>
    %3 = vector.multi_reduction <add>, %2, %cst [1] : vector<16x32xf32> to vector<16xf32>
    %4 = vector.shape_cast %3 : vector<16xf32> to vector<16x1xf32>
    %cst_4 = arith.constant 3.200000e+01 : f32
    %5 = vector.broadcast %cst_4 : f32 to vector<16x1xf32>
    %6 = arith.divf %4, %5 : vector<16x1xf32>
    %7 = vector.broadcast %6 : vector<16x1xf32> to vector<16x32xf32>
    %8 = arith.subf %2, %7 : vector<16x32xf32>
    %9 = arith.mulf %8, %8 : vector<16x32xf32>
    %cst_5 = arith.constant dense<0.000000e+00> : vector<16xf32>
    %10 = vector.multi_reduction <add>, %9, %cst_5 [1] : vector<16x32xf32> to vector<16xf32>
    %11 = vector.shape_cast %10 : vector<16xf32> to vector<16x1xf32>
    %cst_6 = arith.constant 3.200000e+01 : f32
    %12 = vector.broadcast %cst_6 : f32 to vector<16x1xf32>
    %13 = arith.divf %11, %12 : vector<16x1xf32>
    %cst_7 = arith.constant 9.99999974E-6 : f32
    %14 = vector.broadcast %cst_7 : f32 to vector<16x1xf32>
    %15 = arith.addf %13, %14 : vector<16x1xf32>
    %16 = math.rsqrt %15 : vector<16x1xf32>
    %17 = vector.broadcast %16 : vector<16x1xf32> to vector<16x32xf32>
    %18 = arith.mulf %8, %17 : vector<16x32xf32>
    %19 = vector.broadcast %0 : vector<1x32xf32> to vector<16x32xf32>
    %20 = arith.mulf %18, %19 : vector<16x32xf32>
    %21 = vector.broadcast %1 : vector<1x32xf32> to vector<16x32xf32>
    %22 = arith.addf %20, %21 : vector<16x32xf32>
    %23 = arith.truncf %22 : vector<16x32xf32> to vector<16x32xbf16>
    %c0_8 = arith.constant 0 : index
    %c0_9 = arith.constant 0 : index
    %24 = vector.load %arg2[%c0_8, %c0_9] : memref<32x96xbf16, #tpu.memory_space<vmem>>, vector<32x96xbf16>
    %cst_10 = arith.constant dense<0.000000e+00> : vector<16x96xf32>
    %25 = tpu.matmul %23, %24, %cst_10 {dimension_numbers = #tpu.dot_dimension_numbers<[1], [0], [0], [1], [0, 0, 1, 1], [], []>} : vector<16x32xbf16>, vector<32x96xbf16>, vector<16x96xf32> -> vector<16x96xf32>
    %c0_11 = arith.constant 0 : index
    %c0_12 = arith.constant 0 : index
    %26 = vector.load %arg4[%c0_11, %c0_12] : memref<1x96xf32, #tpu.memory_space<vmem>>, vector<1x96xf32>
    %27 = vector.broadcast %26 : vector<1x96xf32> to vector<16x96xf32>
    %28 = arith.addf %25, %27 : vector<16x96xf32>
    %29 = vector.shape_cast %28 : vector<16x96xf32> to vector<1x16x96xf32>
    %30 = arith.truncf %29 : vector<1x16x96xf32> to vector<1x16x96xbf16>
    %c0_13 = arith.constant 0 : index
    %c0_14 = arith.constant 0 : index
    %c0_15 = arith.constant 0 : index
    %31 = vector.load %arg8[%c0_13, %c0_14, %c0_15] : memref<1x16x96xbf16, #tpu.memory_space<vmem>>, vector<1x16x96xbf16>
    tpu.vector_store %arg8[%c0_13, %c0_14, %c0_15], %30 {strides = array<i32>} : memref<1x16x96xbf16, #tpu.memory_space<vmem>>, vector<1x16x96xbf16>,
    %c0_16 = arith.constant 0 : index
    %c0_17 = arith.constant 0 : index
    %c0_18 = arith.constant 0 : index
    %32 = vector.load %arg8[%c0_16, %c0_17, %c0_18] : memref<1x16x96xbf16, #tpu.memory_space<vmem>>, vector<1x8x16xbf16>
    %c0_19 = arith.constant 0 : index
    %c8 = arith.constant 8 : index
    %c32 = arith.constant 32 : index
    %33 = vector.load %arg8[%c0_19, %c8, %c32] : memref<1x16x96xbf16, #tpu.memory_space<vmem>>, vector<1x8x16xbf16>
    %c0_20 = arith.constant 0 : index
    %c8_21 = arith.constant 8 : index
    %c64 = arith.constant 64 : index
    %34 = vector.load %arg8[%c0_20, %c8_21, %c64] : memref<1x16x96xbf16, #tpu.memory_space<vmem>>, vector<1x8x16xbf16>
    "tpu.trace_start"() <{level = 10 : i32, message = "bqd,bkd->bqk"}> : () -> ()
    %cst_22 = arith.constant dense<0.000000e+00> : vector<1x8x8xf32>
    %35 = tpu.matmul %32, %33, %cst_22 {dimension_numbers = #tpu.dot_dimension_numbers<[2], [2], [1], [1], [0, 0, 0, 1, 1, 1], [0], [0]>} : vector<1x8x16xbf16>, vector<1x8x16xbf16>, vector<1x8x8xf32> -> vector<1x8x8xf32>
    "tpu.trace_stop"() : () -> ()
    %cst_23 = arith.constant 2.500000e-01 : f32
    %36 = vector.broadcast %cst_23 : f32 to vector<1x8x8xf32>
    %37 = arith.mulf %35, %36 : vector<1x8x8xf32>
    %cst_24 = arith.constant dense<0xFF800000> : vector<1x8xf32>
    %38 = vector.multi_reduction <maximumf>, %37, %cst_24 [2] : vector<1x8x8xf32> to vector<1x8xf32>
    %39 = vector.shape_cast %38 : vector<1x8xf32> to vector<1x8x1xf32>
    %40 = vector.broadcast %39 : vector<1x8x1xf32> to vector<1x8x8xf32>
    %41 = arith.subf %37, %40 : vector<1x8x8xf32>
    %42 = math.exp %41 : vector<1x8x8xf32>
    %cst_25 = arith.constant dense<0.000000e+00> : vector<1x8xf32>
    %43 = vector.multi_reduction <add>, %42, %cst_25 [2] : vector<1x8x8xf32> to vector<1x8xf32>
    %44 = vector.shape_cast %43 : vector<1x8xf32> to vector<1x8x1xf32>
    %45 = tpu.reciprocal %44 {approx = true} : vector<1x8x1xf32> -> vector<1x8x1xf32>
    %46 = vector.broadcast %45 : vector<1x8x1xf32> to vector<1x8x8xf32>
    %47 = arith.mulf %42, %46 : vector<1x8x8xf32>
    %48 = arith.truncf %47 : vector<1x8x8xf32> to vector<1x8x8xbf16>
    "tpu.trace_start"() <{level = 10 : i32, message = "bqk,bkd->bqd"}> : () -> ()
    %cst_26 = arith.constant dense<0.000000e+00> : vector<1x8x16xf32>
    %49 = tpu.matmul %48, %34, %cst_26 {dimension_numbers = #tpu.dot_dimension_numbers<[2], [1], [1], [2], [0, 0, 0, 1, 1, 2], [0], [0]>} : vector<1x8x8xbf16>, vector<1x8x16xbf16>, vector<1x8x16xf32> -> vector<1x8x16xf32>
    "tpu.trace_stop"() : () -> ()
    %50 = arith.truncf %49 : vector<1x8x16xf32> to vector<1x8x16xbf16>
    %c0_27 = arith.constant 0 : index
    %c0_28 = arith.constant 0 : index
    %c0_29 = arith.constant 0 : index
    %51 = vector.load %arg9[%c0_27, %c0_28, %c0_29] : memref<1x8x32xbf16, #tpu.memory_space<vmem>>, vector<1x8x16xbf16>
    tpu.vector_store %arg9[%c0_27, %c0_28, %c0_29], %50 {strides = array<i32>} : memref<1x8x32xbf16, #tpu.memory_space<vmem>>, vector<1x8x16xbf16>,
    %c0_30 = arith.constant 0 : index
    %c0_31 = arith.constant 0 : index
    %c16 = arith.constant 16 : index
    %52 = vector.load %arg8[%c0_30, %c0_31, %c16] : memref<1x16x96xbf16, #tpu.memory_space<vmem>>, vector<1x8x16xbf16>
    %c0_32 = arith.constant 0 : index
    %c8_33 = arith.constant 8 : index
    %c48 = arith.constant 48 : index
    %53 = vector.load %arg8[%c0_32, %c8_33, %c48] : memref<1x16x96xbf16, #tpu.memory_space<vmem>>, vector<1x8x16xbf16>
    %c0_34 = arith.constant 0 : index
    %c8_35 = arith.constant 8 : index
    %c80 = arith.constant 80 : index
    %54 = vector.load %arg8[%c0_34, %c8_35, %c80] : memref<1x16x96xbf16, #tpu.memory_space<vmem>>, vector<1x8x16xbf16>
    "tpu.trace_start"() <{level = 10 : i32, message = "bqd,bkd->bqk"}> : () -> ()
    %cst_36 = arith.constant dense<0.000000e+00> : vector<1x8x8xf32>
    %55 = tpu.matmul %52, %53, %cst_36 {dimension_numbers = #tpu.dot_dimension_numbers<[2], [2], [1], [1], [0, 0, 0, 1, 1, 1], [0], [0]>} : vector<1x8x16xbf16>, vector<1x8x16xbf16>, vector<1x8x8xf32> -> vector<1x8x8xf32>
    "tpu.trace_stop"() : () -> ()
    %cst_37 = arith.constant 2.500000e-01 : f32
    %56 = vector.broadcast %cst_37 : f32 to vector<1x8x8xf32>
    %57 = arith.mulf %55, %56 : vector<1x8x8xf32>
    %cst_38 = arith.constant dense<0xFF800000> : vector<1x8xf32>
    %58 = vector.multi_reduction <maximumf>, %57, %cst_38 [2] : vector<1x8x8xf32> to vector<1x8xf32>
    %59 = vector.shape_cast %58 : vector<1x8xf32> to vector<1x8x1xf32>
    %60 = vector.broadcast %59 : vector<1x8x1xf32> to vector<1x8x8xf32>
    %61 = arith.subf %57, %60 : vector<1x8x8xf32>
    %62 = math.exp %61 : vector<1x8x8xf32>
    %cst_39 = arith.constant dense<0.000000e+00> : vector<1x8xf32>
    %63 = vector.multi_reduction <add>, %62, %cst_39 [2] : vector<1x8x8xf32> to vector<1x8xf32>
    %64 = vector.shape_cast %63 : vector<1x8xf32> to vector<1x8x1xf32>
    %65 = tpu.reciprocal %64 {approx = true} : vector<1x8x1xf32> -> vector<1x8x1xf32>
    %66 = vector.broadcast %65 : vector<1x8x1xf32> to vector<1x8x8xf32>
    %67 = arith.mulf %62, %66 : vector<1x8x8xf32>
    %68 = arith.truncf %67 : vector<1x8x8xf32> to vector<1x8x8xbf16>
    "tpu.trace_start"() <{level = 10 : i32, message = "bqk,bkd->bqd"}> : () -> ()
    %cst_40 = arith.constant dense<0.000000e+00> : vector<1x8x16xf32>
    %69 = tpu.matmul %68, %54, %cst_40 {dimension_numbers = #tpu.dot_dimension_numbers<[2], [1], [1], [2], [0, 0, 0, 1, 1, 2], [0], [0]>} : vector<1x8x8xbf16>, vector<1x8x16xbf16>, vector<1x8x16xf32> -> vector<1x8x16xf32>
    "tpu.trace_stop"() : () -> ()
    %70 = arith.truncf %69 : vector<1x8x16xf32> to vector<1x8x16xbf16>
    %c0_41 = arith.constant 0 : index
    %c0_42 = arith.constant 0 : index
    %c16_43 = arith.constant 16 : index
    %71 = vector.load %arg9[%c0_41, %c0_42, %c16_43] : memref<1x8x32xbf16, #tpu.memory_space<vmem>>, vector<1x8x16xbf16>
    tpu.vector_store %arg9[%c0_41, %c0_42, %c16_43], %70 {strides = array<i32>} : memref<1x8x32xbf16, #tpu.memory_space<vmem>>, vector<1x8x16xbf16>,
    %c0_44 = arith.constant 0 : index
    %c0_45 = arith.constant 0 : index
    %c0_46 = arith.constant 0 : index
    %72 = vector.load %arg9[%c0_44, %c0_45, %c0_46] : memref<1x8x32xbf16, #tpu.memory_space<vmem>>, vector<1x8x32xbf16>
    %73 = vector.shape_cast %72 : vector<1x8x32xbf16> to vector<8x32xbf16>
    %c0_47 = arith.constant 0 : index
    %c0_48 = arith.constant 0 : index
    %74 = vector.load %arg6[%c0_47, %c0_48] : memref<4x128xf32, #tpu.memory_space<vmem>>, vector<1x128xf32>
    %c1_49 = arith.constant 1 : index
    %c0_50 = arith.constant 0 : index
    %75 = vector.load %arg6[%c1_49, %c0_50] : memref<4x128xf32, #tpu.memory_space<vmem>>, vector<1x128xf32>
    %c2 = arith.constant 2 : index
    %c0_51 = arith.constant 0 : index
    %76 = vector.load %arg6[%c2, %c0_51] : memref<4x128xf32, #tpu.memory_space<vmem>>, vector<1x128xf32>
    %c3 = arith.constant 3 : index
    %c0_52 = arith.constant 0 : index
    %77 = vector.load %arg6[%c3, %c0_52] : memref<4x128xf32, #tpu.memory_space<vmem>>, vector<1x128xf32>
    %c0_53 = arith.constant 0 : index
    %c0_54 = arith.constant 0 : index
    %78 = vector.load %arg3[%c0_53, %c0_54] : memref<32x128xbf16, #tpu.memory_space<vmem>>, vector<32x128xbf16>
    %cst_55 = arith.constant dense<0.000000e+00> : vector<8x128xf32>
    %79 = tpu.matmul %73, %78, %cst_55 {dimension_numbers = #tpu.dot_dimension_numbers<[1], [0], [0], [1], [0, 0, 1, 1], [], []>} : vector<8x32xbf16>, vector<32x128xbf16>, vector<8x128xf32> -> vector<8x128xf32>
    %80 = vector.broadcast %76 : vector<1x128xf32> to vector<8x128xf32>
    %81 = arith.addf %79, %80 : vector<8x128xf32>
    %cst_56 = arith.constant dense<0.000000e+00> : vector<8xf32>
    %82 = vector.multi_reduction <add>, %81, %cst_56 [1] : vector<8x128xf32> to vector<8xf32>
    %83 = vector.shape_cast %82 : vector<8xf32> to vector<8x1xf32>
    %cst_57 = arith.constant 3.125000e-02 : f32
    %84 = vector.broadcast %cst_57 : f32 to vector<8x1xf32>
    %85 = arith.mulf %83, %84 : vector<8x1xf32>
    %86 = vector.broadcast %85 : vector<8x1xf32> to vector<8x128xf32>
    %87 = arith.subf %81, %86 : vector<8x128xf32>
    %88 = vector.broadcast %77 : vector<1x128xf32> to vector<8x128xf32>
    %89 = arith.mulf %87, %88 : vector<8x128xf32>
    %90 = arith.mulf %89, %89 : vector<8x128xf32>
    %cst_58 = arith.constant dense<0.000000e+00> : vector<8xf32>
    %91 = vector.multi_reduction <add>, %90, %cst_58 [1] : vector<8x128xf32> to vector<8xf32>
    %92 = vector.shape_cast %91 : vector<8xf32> to vector<8x1xf32>
    %cst_59 = arith.constant 3.125000e-02 : f32
    %93 = vector.broadcast %cst_59 : f32 to vector<8x1xf32>
    %94 = arith.mulf %92, %93 : vector<8x1xf32>
    %cst_60 = arith.constant 9.99999974E-6 : f32
    %95 = vector.broadcast %cst_60 : f32 to vector<8x1xf32>
    %96 = arith.addf %94, %95 : vector<8x1xf32>
    %97 = math.rsqrt %96 : vector<8x1xf32>
    %98 = vector.broadcast %97 : vector<8x1xf32> to vector<8x128xf32>
    %99 = arith.mulf %89, %98 : vector<8x128xf32>
    %100 = vector.broadcast %74 : vector<1x128xf32> to vector<8x128xf32>
    %101 = arith.mulf %99, %100 : vector<8x128xf32>
    %102 = vector.broadcast %75 : vector<1x128xf32> to vector<8x128xf32>
    %103 = arith.addf %101, %102 : vector<8x128xf32>
    %104 = arith.addf %81, %103 : vector<8x128xf32>
    %c0_61 = arith.constant 0 : index
    %c0_62 = arith.constant 0 : index
    %105 = vector.load %arg7[%c0_61, %c0_62] : memref<8x128xf32, #tpu.memory_space<vmem>>, vector<8x128xf32>
    tpu.vector_store %arg7[%c0_61, %c0_62], %104 {strides = array<i32>} : memref<8x128xf32, #tpu.memory_space<vmem>>, vector<8x128xf32>,
    return
  }
  func.func @transform_0(%arg0: i32) -> (i32, i32) {
    %c0_i32 = arith.constant 0 : i32
    %c0_i32_0 = arith.constant 0 : i32
    return %arg0, %c0_i32 : i32, i32
  }
  func.func @transform_1(%arg0: i32) -> (i32, i32) {
    %c0_i32 = arith.constant 0 : i32
    %c0_i32_0 = arith.constant 0 : i32
    %c0_i32_1 = arith.constant 0 : i32
    return %c0_i32, %c0_i32_0 : i32, i32
  }
  func.func @transform_2(%arg0: i32) -> (i32, i32) {
    %c0_i32 = arith.constant 0 : i32
    %c0_i32_0 = arith.constant 0 : i32
    %c0_i32_1 = arith.constant 0 : i32
    return %c0_i32, %c0_i32_0 : i32, i32
  }
  func.func @transform_3(%arg0: i32) -> (i32, i32) {
    %c0_i32 = arith.constant 0 : i32
    %c0_i32_0 = arith.constant 0 : i32
    %c0_i32_1 = arith.constant 0 : i32
    return %c0_i32, %c0_i32_0 : i32, i32
  }
  func.func @transform_4(%arg0: i32) -> (i32, i32) {
    %c0_i32 = arith.constant 0 : i32
    %c0_i32_0 = arith.constant 0 : i32
    %c0_i32_1 = arith.constant 0 : i32
    return %c0_i32, %c0_i32_0 : i32, i32
  }
  func.func @transform_5(%arg0: i32) -> (i32, i32) {
    %c0_i32 = arith.constant 0 : i32
    %c0_i32_0 = arith.constant 0 : i32
    %c0_i32_1 = arith.constant 0 : i32
    return %c0_i32, %c0_i32_0 : i32, i32
  }
  func.func @transform_6(%arg0: i32) -> (i32, i32) {
    %c0_i32 = arith.constant 0 : i32
    %c0_i32_0 = arith.constant 0 : i32
    return %arg0, %c0_i32 : i32, i32
  }
}

</mosaic_0001>

<bundles_post_ra>
// kernel: tpu_custom_call.1
= control target key start
LH: loop header
LB: loop body
LE: loop exit
PB: predicated region body
PF: predicated region fallthrough
CT: control target
= control target key end

     0   :  { %11 = vsyncpa [#allocation5], 0  ;;  %s1547_s0 = inlined_call_operand.hbm [shape: f32[32,32], index: 0, kind: input, shape index: {}]   ;;  %s1548_s1 = inlined_call_operand.hbm [shape: bf16[32,96], index: 1, kind: input, shape index: {}]   ;;  %s1549_s2 = inlined_call_operand.hbm [shape: bf16[32,128], index: 2, kind: input, shape index: {}]   ;;  %s1550_s3 = inlined_call_operand.vmem [shape: f32[1,96], index: 3, kind: input, shape index: {}]   ;;  %s1551_s4 = inlined_call_operand.vmem [shape: f32[2,32], index: 4, kind: input, shape index: {}]   ;;  %s1552_s5 = inlined_call_operand.vmem [shape: f32[4,128], index: 5, kind: input, shape index: {}]   ;;  %s1553_s6 = inlined_call_operand.hbm [shape: f32[16,128], index: 6, kind: output, shape index: {}]  }
   0x1   :  { %13 = vsyncpa [#allocation5 + $0x1], 0 }
   0x2   :  { %14 = vsyncpa [#allocation8], 0 }
   0x3   :  { %15 = vsyncpa [#allocation6], 0 }
   0x4   :  { %17 = vsyncpa [#allocation6 + $0x1], 0  ;;  %s1256_s21 = smov 0   ;;  %s1258_s22 = smov 0  }
   0x5   :  { %s1260_s23 = smov 0   ;;  %s1262_s24 = smov 0  }
   0x6 LB: > { %s1277_s25 = sadd.s32 4294967295, %s1203_s24   ;;  %s859_s26 = sadd.s32 4294967294, %s1203_s24   ;;  %s1203_s24 = sphi %s1262_s24, %s1573_s24   ;;  %s1199_s23 = sphi %s1260_s23, %s1572_s23   ;;  %s1195_s22 = sphi %s1258_s22, %s1571_s22   ;;  %s1191_s21 = sphi %s1256_s21, %s1570_s21  }
   0x7   : > { %p43_p0 = scmp.ne.s32.totalorder %s1195_s22, %s1191_s21  ;;  %p1554_p1 = scmp.eq.s32.totalorder %s1277_s25, 0 }
   0x8   : > { %p178_p3 = scmp.eq.s32.totalorder %s859_s26, 1  ;;  %p860_p5 = scmp.ge.s32.totalorder %s1203_s24, 1 }
   0x9   : > { %p1286_p4 = por %p1554_p1, %p43_p0  ;;  %p185_p7 = scmp.lt.s32.totalorder %s1203_s24, 3 }
   0xa   : > { %p1291_p6 = por %p178_p3, %p43_p0  ;;  %s1205_s30 = smov [#allocation7]  }
   0xb   : > { %s1557_s27 = scalar_select %p1286_p4, 1, 0 }
   0xc   : > { %s1558_s28 = scalar_select %p1291_p6, 1, 0 }
   0xd   : > { %p1296_p8 = pnand %p860_p5, %p185_p7  ;;  %s197_s7 = sshll.u32 %s1205_s30, 4  ;;  %s1300_s7 = int_to_ptr.vmem [resolvable:$true] %s197_s7 }
   0xe   : > { %s1206_s9 = smov [#allocation9]   ;;  %s1047_s13 = scalar_lea.hbm %s1548_s1, 256 }
   0xf   : > { %p962_p9 = pneg %p1296_p8  ;;  %s210_s10 = sshll.u32 %s1206_s9, 4  ;;  %s1311_s10 = int_to_ptr.vmem [resolvable:$true] %s210_s10 }
  0x10   : > { %p1048_p12 = scmp.ne.s32.totalorder %s1548_s1, %s1047_s13  ;;  %p1054_p5 = scmp.lt.u32.totalorder %s1047_s13, %s1548_s1 }
  0x11   : > { %p1307_p11 = pnand %p962_p9, %p1554_p1 }
  0x13   : > { %p1049_p13 = pneg %p1307_p11 }
  0x15   : > { %p1050_p0 = pnand %p1049_p13, %p1048_p12 }
  0x17   : > { %p1051_p3 = pneg %p1050_p0 }
  0x19   : > { %p1056_p7 = pnand %p1054_p5, %p1051_p3 }
  0x1b   : > { %1059 = shalt.err (!%p1056_p7)
}
  0x1c   : > { %s1060_s18 = scalar_lea.vmem %s1300_s7, 256  ;;  %p1068_p2 = scmp.lt.s32.totalorder %s1300_s7, %s1300_s7 }
  0x1d   : > { %p1061_p9 = scmp.ne.s32.totalorder %s1300_s7, %s1060_s18  ;;  %p1069_p12 = scmp.lt.s32.totalorder %s1060_s18, %s1060_s18 }
  0x1f   : > { %p1063_p10 = pnand %p1061_p9, %p1049_p13  ;;  %p1070_p0 = por %p1069_p12, %p1068_p2 }
  0x21   : > { %p1064_p1 = pneg %p1063_p10 }
  0x23   : > { %p1071_p6 = pnand %p1070_p0, %p1064_p1 }
  0x25   : > { %1074 = shalt.err (!%p1071_p6)
}
  0x26   : > { %s1207_s19 = smov 64   ;;  %s1208_s20 = smov 4  }
  0x27   : > { %965 = dma.hbm_to_vmem [thread:$0]  (!%p1307_p11), %s1548_s1, 256, %s1300_s7, [#allocation8], %s1207_s19, %s1207_s19, %s1208_s20  }
  0x28   : > { %s1075_s12 = scalar_lea.hbm %s1549_s2, 256 }
  0x29   : > { %p1076_p2 = scmp.ne.s32.totalorder %s1549_s2, %s1075_s12  ;;  %p1082_p10 = scmp.lt.u32.totalorder %s1075_s12, %s1549_s2 }
  0x2b   : > { %p1078_p1 = pnand %p1076_p2, %p1049_p13 }
  0x2d   : > { %p1079_p6 = pneg %p1078_p1 }
  0x2f   : > { %p1084_p3 = pnand %p1082_p10, %p1079_p6 }
  0x31   : > { %1087 = shalt.err (!%p1084_p3)
}
  0x32   : > { %s1088_s7 = scalar_lea.vmem %s1311_s10, 256  ;;  %p1096_p12 = scmp.lt.s32.totalorder %s1311_s10, %s1311_s10 }
  0x33   : > { %p1089_p5 = scmp.ne.s32.totalorder %s1311_s10, %s1088_s7  ;;  %p1097_p0 = scmp.lt.s32.totalorder %s1088_s7, %s1088_s7 }
  0x35   : > { %p1091_p7 = pnand %p1089_p5, %p1049_p13  ;;  %p1098_p2 = por %p1097_p0, %p1096_p12 }
  0x37   : > { %p1092_p9 = pneg %p1091_p7 }
  0x39   : > { %p1099_p1 = pnand %p1098_p2, %p1092_p9 }
  0x3b   : > { %1102 = shalt.err (!%p1099_p1)
}
  0x3c   : > { %968 = dma.hbm_to_vmem [thread:$0]  (!%p1307_p11), %s1549_s2, 256, %s1311_s10, [#allocation8], %s1207_s19, %s1207_s19, %s1208_s20  }
  0x3d   : > { %s1366_s26 = sadd.s32 1, %s1203_s24   ;;  %s30_s8 = sadd.s32 1, %s1199_s23 }
  0x3e   : > { %s27_s30 = ssub.s32 %s1203_s24, %s1366_s26  ;;  %p37_p13 = scmp.ne.s32.totalorder %s1199_s23, %s1195_s22 }
  0x3f   : > { %p28_p6 = scmp.eq.s32.totalorder %s27_s30, 0  ;;  %p38_p10 = scmp.eq.s32.totalorder %s1203_s24, 0 }
  0x40   : > { %p1561_p3 = scmp.eq.s32.totalorder %s1277_s25, 1  ;;  %p979_p7 = scmp.lt.s32.totalorder %s1203_s24, 2 }
  0x41   : > { %s1382_s11 = scalar_select %p28_p6, %s1199_s23, %s30_s8  }
  0x42   : > { %p1376_p5 = por %p1561_p3, %p37_p13  ;;  %p39_p9 = por %p38_p10, %p37_p13 }
  0x43   : > { %s233_s12 = sand.u32 1, %s1199_s23   ;;  %s894_s10 = sshll.u32 %s1203_s24, 8 }
  0x44   : > { %s1562_s9 = scalar_select %p1376_p5, 1, 0 }
  0x45   : > { %s864_s13 = sshll.u32 %s233_s12, 4  ;;  %s1389_s14 = scalar_lea.hbm %s1547_s0, %s894_s10 }
  0x46   : > { %s237_s15 = scalar_lea.vmem [#allocation4], %s864_s13  ;;  %p1393_p11 = pnand %p979_p7, %p39_p9 }
  0x47   : > { %s244_s16 = sshll.u32 %s237_s15, 4  ;;  %s1397_s17 = scalar_lea.sflag [#allocation5], %s233_s12  ;;  %s1391_s16 = int_to_ptr.vmem [resolvable:$true] %s244_s16 }
  0x48   : > { %s1103_s18 = scalar_lea.hbm %s1389_s14, 256  ;;  %p1105_p0 = pneg %p1393_p11 }
  0x49   : > { %p1104_p12 = scmp.ne.s32.totalorder %s1389_s14, %s1103_s18  ;;  %s1108_s13 = scalar_lea.hbm %s1547_s0, 512 }
  0x4a   : > { %p1109_p13 = scmp.lt.u32.totalorder %s1389_s14, %s1547_s0  ;;  %p1110_p6 = scmp.lt.u32.totalorder %s1108_s13, %s1103_s18 }
  0x4b   : > { %p1106_p2 = pnand %p1105_p0, %p1104_p12  ;;  %p1112_p3 = scmp.lt.u32.totalorder %s1103_s18, %s1389_s14 }
  0x4c   : > { %p1111_p10 = por %p1110_p6, %p1109_p13 }
  0x4d   : > { %p1107_p1 = pneg %p1106_p2 }
  0x4e   : > { %p1113_p7 = por %p1112_p3, %p1111_p10 }
  0x50   : > { %p1114_p9 = pnand %p1113_p7, %p1107_p1 }
  0x52   : > { %1117 = shalt.err (!%p1114_p9)
}
  0x53   : > { %s1118_s12 = scalar_lea.vmem %s1391_s16, 256  ;;  %s1209_s20 = smov [#allocation4]  }
  0x54   : > { %p1119_p12 = scmp.ne.s32.totalorder %s1391_s16, %s1118_s12  ;;  %s1123_s15 = sshll.u32 %s1209_s20, 4  ;;  %s1124_s15 = int_to_ptr.vmem [resolvable:$false] %s1123_s15 }
  0x55   : > { %s1125_s8 = scalar_lea.vmem %s1124_s15, 512  ;;  %p1126_p4 = scmp.lt.s32.totalorder %s1391_s16, %s1124_s15 }
  0x56   : > { %p1121_p2 = pnand %p1119_p12, %p1105_p0  ;;  %p1127_p13 = scmp.lt.s32.totalorder %s1125_s8, %s1118_s12 }
  0x58   : > { %p1122_p5 = pneg %p1121_p2  ;;  %p1128_p6 = por %p1127_p13, %p1126_p4 }
  0x5a   : > { %p1129_p10 = pnand %p1128_p6, %p1122_p5 }
  0x5c   : > { %1132 = shalt.err (!%p1129_p10)
}
  0x5d   : > { %s1210_s18 = smov 128   ;;  %s1211_s30 = smov 8  }
  0x5e   : > { %972 = dma.hbm_to_vmem [thread:$0]  (!%p1393_p11), %s1389_s14, 256, %s1391_s16, %s1397_s17, %s1210_s18, %s1210_s18, %s1211_s30  }
  0x5f   : > { %256 = sbr.rel (%p1296_p8) target bundleno = 2196 (0x894), region = 44  ;;  %s1428_s13 = sand.u32 (!%p1296_p8), 1, %s1195_s22  }
  0x60   : > { %s868_s10 = sshll.u32 (!%p1296_p8), %s1428_s13, 4  ;;  %s259_s19 = scalar_lea.sflag (!%p1296_p8), [#allocation5], %s1428_s13 }
  0x61   : > { %s262_s12 = scalar_lea.vmem (!%p1296_p8), [#allocation4], %s868_s10  ;;  %p1564_p4 = scmp.ne.s32.totalorder (!%p1296_p8), %s1557_s27, 0 }
  0x66   : > { %1178 = dma.done.wait (%p1564_p4), %s259_s19, 256  }
  0x67   : > { %1180 = vsyncadd (%p1564_p4), %s259_s19, 4294967040  ;;  %p1565_p5 = scmp.eq.s32.totalorder %s1277_s25, 0 }
  0x69   : > { %1182 = dma.done.wait (%p1565_p5), [#allocation8], 512   ;;  %p1566_p11 = pmov %p1565_p5 }
  0x6a   : > { %vm305_vm0 = vcmask 261120   ;;  %v303_v0 = vld [vmem:[%s262_s12] sm:$0xff]  ;;  %v304_v1 = vld [vmem:[%s262_s12 + $0x8] sm:$0xff]  ;;  %v1212_v15 = vmov 0.0   ;;  %vm1213_vm1 = vmmov 0   ;;  %vm414_vm2 = vcmask 785408  }
  0x6b   : > { %1184 = vsyncadd (%p1566_p11), [#allocation8], 4294966784  ;;  %v306_v2 = vsel %vm305_vm0, %v303_v0, 0.0  ;;  %v309_v3 = vsel %vm305_vm0, %v304_v1, 0.0  ;;  %v1029_v14 = vld [vmem:[#allocation7] sm:$0xff]   ;;  %910 = vmatprep.subr.bf16.mxu0 %v1212_v15  ;;  %918 = vmatprep.subr.bf16.mxu1 %v1212_v15  ;;  %v1030_v16 = vld [vmem:[#allocation7 + $0x8] sm:$0xff]  }
  0x6c   : > { %307 = vadd.xlane.f32.xlu0 %v306_v2  ;;  %911 = vmatpush3.bf16.msra.mxu0 %v1029_v14  ;;  %v872_v25 = vld [vmem:[%s1551_s4] ss:$0 sm:$0xff]  ;;  %v873_v29 = vld [vmem:[%s1551_s4 + $0x1] ss:$0 sm:$0xff]  ;;  %s1214_s20 = smov 80   ;;  %s1215_s15 = smov 96  }
  0x6d   : > { %914 = vmatprep.mubr.msk.bf16.mxu0 %vm1213_vm1, %v1212_v15  ;;  %912 = vmatprep.subr.bf16.mxu0 %v1212_v15  ;;  %v874_v34 = vld [vmem:[%s1550_s3] ss:$0 sm:$0xff]  ;;  %s1216_s8 = smov 112   ;;  %vm422_vm3 = vcmask 130048   ;;  %vm470_vm4 = vcmask 64512   ;;  %s1217_s18 = smov 64  }
  0x6e   : > { %920 = vmatprep.mubr.msk.bf16.mxu1 %vm1213_vm1, %v1212_v15  ;;  %vm488_vm5 = vcmask 1043456   ;;  %s1218_s30 = smov 48   ;;  %vm533_vm6 = vcmask 125952   ;;  %s1219_s10 = smov 16   ;;  %vm658_vm7 = vcmask 257152  }
  0x6f   : > { %s871_s14 = sshll.u32 %s1428_s13, 3  ;;  %s757_s12 = scalar_lea.sflag [#allocation6], %s1428_s13 }
  0x70   : > { %310 = vadd.xlane.f32.xlu0 %v309_v3  ;;  %913 = vmatpush3.bf16.msra.mxu0 %v1030_v16  ;;  %p1567_p0 = scmp.ne.s32.totalorder %s1562_s9, 0 }
  0x71   : > { %924 = vmatprep.subr.bf16.mxu0 %v1212_v15 }
  0xf9   : > { %v308_v4 = vpop.xlane.xlu0 %307 }
  0xfa   : > { %v313_v5 = vmul.f32 0.03125, %v308_v4 }
  0xfc   : > { %v315_v6 = vsub.f32 %v303_v0, %v313_v5 }
  0xfd   : > { %v311_v7 = vpop.xlane.xlu0 %310 }
  0xfe   : > { %v314_v8 = vmul.f32 0.03125, %v311_v7  ;;  %v317_v9 = vmul.f32 %v315_v6, %v315_v6 }
 0x100   : > { %v316_v10 = vsub.f32 %v304_v1, %v314_v8  ;;  %v319_v11 = vsel %vm305_vm0, %v317_v9, 0.0 }
 0x101   : > { %320 = vadd.xlane.f32.xlu1 %v319_v11 }
 0x102   : > { %v318_v12 = vmul.f32 %v316_v10, %v316_v10 }
 0x104   : > { %v322_v13 = vsel %vm305_vm0, %v318_v12, 0.0 }
 0x105   : > { %323 = vadd.xlane.f32.xlu1 %v322_v13 }
 0x18e   : > { %v321_v17 = vpop.xlane.xlu1 %320 }
 0x18f   : > { %v325_v18 = vmul.f32 0.03125, %v321_v17 }
 0x191   : > { %v327_v19 = vadd.f32 1e-05, %v325_v18 }
 0x192   : > { %v324_v20 = vpop.xlane.xlu1 %323 }
 0x193   : > { %1033 = vrsqrt.f32 %v327_v19  ;;  %v326_v21 = vmul.f32 0.03125, %v324_v20 }
 0x195   : > { %v328_v22 = vadd.f32 1e-05, %v326_v21 }
 0x197   : > { %1035 = vrsqrt.f32 %v328_v22 }
 0x19d   : > { %v1034_v23 = vpop.eup %1033 }
 0x19e   : > { %v331_v24 = vmul.f32 %v1034_v23, %v315_v6 }
 0x1a0   : > { %v337_v28 = vmul.f32 %v872_v25, %v331_v24  ;;  %v1031_v24 = vld [vmem:[#allocation9] sm:$0xff]  }
 0x1a1   : > { %v1036_v26 = vpop.eup %1035 }
 0x1a2   : > { %v332_v27 = vmul.f32 %v1036_v26, %v316_v10  ;;  %v343_v31 = vadd.f32 %v873_v29, %v337_v28  ;;  %v1032_v26 = vld [vmem:[#allocation9 + $0x8] sm:$0xff]  }
 0x1a4   : > { %v338_v30 = vmul.f32 %v872_v25, %v332_v27 }
 0x1a6   : > { %v344_v32 = vadd.f32 %v873_v29, %v338_v30 }
 0x1a8   : > { %v345_v33 = vpack.c.bf16 %v344_v32, %v343_v31 }
 0x1aa   : > { %915 = vmatmul.mubr.msk.bf16.vlgmr.msra.gmra.mrb[0].mxu0 %vm305_vm0, %v345_v33 }
 0x1ab   : > { %926 = vmatprep.mubr.msk.bf16.mxu0 %vm1213_vm1, %v1212_v15 }
 0x27d   : > { %v406_v35 = vpop.f32.mrb[0].mxu0 }
 0x27e   : > { %v916_v36 = vpop.f32.mrb[1].mxu0  ;;  %v407_v38 = vadd.f32 %v874_v34, %v406_v35 }
 0x27f   : > { %v409_v37 = vpop.f32.mrb[2].mxu0 }
 0x280   : > { %v410_v39 = vadd.f32 %v874_v34, %v409_v37  ;;  %v917_v40 = vpop.f32.mrb[3].mxu0 }
 0x282   : > { %v413_v41 = vpack.c.bf16 %v410_v39, %v407_v38 }
 0x284   : > { %415 = vst.msk [vmem:[#allocation2] sm:$0xff] %vm414_vm2, %v413_v41 }
 0x28b   : > { %v1464_v42 = vld [vmem:[#allocation2] sm:$0xf0]  ;;  %v535_v46 = vld [vmem:[#allocation2] sm:$0xf] }
 0x28c   : > { %v417_v43 = vld [vmem:[#allocation2] sm:$0xf0]  ;;  %v541_v44 = vrot.slane %v1464_v42, 4  ;;  %v416_v50 = vld [vmem:[#allocation2] sm:$0xf] }
 0x28d   : > { %v419_v45 = vrot.slane %v417_v43, 4 }
 0x28e   : > { %542 = vrot.lane.b32.xlu1 %v541_v44, %s1214_s20 }
 0x28f   : > { %420 = vrot.lane.b32.xlu0 %v419_v45, %s1215_s15  ;;  %s891_s15 = sshll.u32 %s1277_s25, 7  ;;  %s1220_s25 = smov [#allocation10]  }
 0x290   : > { %s1503_s19 = scalar_lea.hbm %s1553_s6, %s891_s15  ;;  %s1137_s29 = sshll.u32 %s1220_s25, 4  ;;  %s1138_s29 = int_to_ptr.vmem [resolvable:$false] %s1137_s29 }
 0x292   : > { %538 = vrot.lane.b32.xlu1 %v535_v46, %s1216_s8  ;;  %s298_s8 = scalar_lea.vmem [#allocation10], %s871_s14  ;;  %s1139_s14 = scalar_lea.vmem %s1138_s29, 256 }
 0x300   : > { %v543_v49 = vpop.permute.xlu1 %542 }
 0x301   : > { %v421_v47 = vpop.permute.xlu0 %420  ;;  %v548_v51 = vsel %vm422_vm3, %v543_v49, 0 }
 0x302   : > { %v427_v48 = vsel %vm422_vm3, %v421_v47, 0 }
 0x303   : > { %919 = vmatpush3.bf16.xpose.msra.mxu1 %v427_v48 }
 0x304   : > { %930 = vmatprep.subr.bf16.mxu1 %v1212_v15  ;;  %v539_v52 = vpop.permute.xlu1 %538 }
 0x30a   : > { %921 = vmatmul.mubr.msk.bf16.vlgmr.msra.gmra.mrb[0].mxu1 %vm422_vm3, %v416_v50 }
 0x30b   : > { %931 = vmatpush3.bf16.xpose.msra.mxu1 %v548_v51  ;;  %932 = vmatprep.mubr.msk.bf16.mxu1 %vm1213_vm1, %v1212_v15 }
 0x30c   : > { %942 = vmatprep.subr.bf16.mxu1 %v1212_v15 }
 0x312   : > { %933 = vmatmul.mubr.msk.bf16.vlgmr.msra.gmra.mrb[4].mxu1 %vm422_vm3, %v539_v52 }
 0x313   : > { %946 = vmatprep.mubr.msk.bf16.mxu1 %vm1213_vm1, %v1212_v15  ;;  %943 = vmatpush3.bf16.msra.mxu1 %v1031_v24 }
 0x314   : > { %944 = vmatprep.subr.bf16.mxu1 %v1212_v15 }
 0x317   : > { %945 = vmatpush3.bf16.msra.mxu1 %v1032_v26 }
 0x3dd   : > { %v463_v53 = vpop.f32.mrb[0].mxu1 }
 0x3de   : > { %v469_v54 = vmul.f32 0.25, %v463_v53  ;;  %v922_v55 = vpop.f32.mrb[1].mxu1  ;;  %v888_v53 = vld [vmem:[%s1552_s5] ss:$0 sm:$0xff] }
 0x3df   : > { %v466_v56 = vpop.f32.mrb[2].mxu1  ;;  %v889_v55 = vld [vmem:[%s1552_s5 + $0x1] ss:$0 sm:$0xff] }
 0x3e0   : > { %v923_v57 = vpop.f32.mrb[3].mxu1  ;;  %v471_v58 = vsel %vm470_vm4, %v469_v54, -inf }
 0x3e1   : > { %472 = vmax.xlane.f32.xlu1 %v471_v58 }
 0x3e5   : > { %v584_v59 = vpop.f32.mrb[4].mxu1 }
 0x3e6   : > { %v590_v60 = vmul.f32 0.25, %v584_v59  ;;  %v934_v61 = vpop.f32.mrb[5].mxu1 }
 0x3e7   : > { %v587_v62 = vpop.f32.mrb[6].mxu1 }
 0x3e8   : > { %v935_v63 = vpop.f32.mrb[7].mxu1  ;;  %v591_v0 = vsel %vm470_vm4, %v590_v60, -inf }
 0x3e9   : > { %592 = vmax.xlane.f32.xlu0 %v591_v0 }
 0x3f2   : > { %483 = vrot.lane.b32.xlu1 %v419_v45, %s1217_s18  ;;  %v887_v45 = vld [vmem:[%s1552_s5 + $0x3] ss:$0 sm:$0xff]  ;;  %s770_s18 = sshll.u32 %s298_s8, 4  ;;  %s1505_s18 = int_to_ptr.vmem [resolvable:$true] %s770_s18 }
 0x3f3   : > { %s1133_s27 = scalar_lea.vmem %s1505_s18, 128  ;;  %p1140_p7 = scmp.lt.s32.totalorder %s1505_s18, %s1138_s29 }
 0x3f4   : > { %p1134_p8 = scmp.ne.s32.totalorder %s1505_s18, %s1133_s27  ;;  %p1141_p9 = scmp.lt.s32.totalorder %s1139_s14, %s1133_s27 }
 0x3f6   : > { %p1135_p1 = pnand %p1134_p8, %p1567_p0  ;;  %p1142_p12 = por %p1141_p9, %p1140_p7 }
 0x3f8   : > { %p1136_p3 = pneg %p1135_p1 }
 0x3fa   : > { %p1143_p2 = pnand %p1142_p12, %p1136_p3 }
 0x46e   : > { %v473_v1 = vpop.xlane.xlu1 %472 }
 0x46f   : > { %v474_v2 = vsub.f32 %v469_v54, %v473_v1 }
 0x471   : > { %v475_v3 = vmul.f32 1.442695, %v474_v2 }
 0x472   : > { %v484_v4 = vpop.permute.xlu1 %483 }
 0x473   : > { %1037 = vpow2.f32 %v475_v3  ;;  %v490_v5 = vsel %vm488_vm5, %v484_v4, 0 }
 0x474   : > { %925 = vmatpush3.bf16.msra.mxu0 %v490_v5 }
 0x475   : > { %936 = vmatprep.subr.bf16.mxu0 %v1212_v15 }
 0x476   : > { %v593_v6 = vpop.xlane.xlu0 %592 }
 0x477   : > { %v594_v7 = vsub.f32 %v590_v60, %v593_v6 }
 0x479   : > { %v595_v8 = vmul.f32 1.442695, %v594_v7 }
 0x47b   : > { %1039 = vpow2.f32 %v595_v8 }
 0x47d   : > { %v1038_v9 = vpop.eup %1037 }
 0x47e   : > { %v477_v10 = vsel %vm470_vm4, %v1038_v9, 0.0 }
 0x47f   : > { %478 = vadd.xlane.f32.xlu0 %v477_v10 }
 0x485   : > { %v1040_v11 = vpop.eup %1039 }
 0x486   : > { %v597_v12 = vsel %vm470_vm4, %v1040_v11, 0.0 }
 0x487   : > { %598 = vadd.xlane.f32.xlu0 %v597_v12 }
 0x49d   : > { %603 = vrot.lane.b32.xlu0 %v541_v44, %s1218_s30 }
 0x50c   : > { %v479_v13 = vpop.xlane.xlu0 %478 }
 0x50d   : > { %1041 = vrcp.f32 %v479_v13 }
 0x514   : > { %v599_v14 = vpop.xlane.xlu0 %598 }
 0x515   : > { %1043 = vrcp.f32 %v599_v14 }
 0x517   : > { %v1042_v16 = vpop.eup %1041 }
 0x518   : > { %v481_v17 = vmul.f32 %v1042_v16, %v1038_v9  ;;  %v604_v18 = vpop.permute.xlu0 %603 }
 0x519   : > { %v609_v20 = vsel %vm488_vm5, %v604_v18, 0 }
 0x51a   : > { %v482_v19 = vpack.c.bf16 %v481_v17, %v481_v17 }
 0x51c   : > { %927 = vmatmul.mubr.msk.bf16.vlgmr.msra.gmra.mrb[4].mxu0 %vm470_vm4, %v482_v19 }
 0x51d   : > { %937 = vmatpush3.bf16.msra.mxu0 %v609_v20  ;;  %938 = vmatprep.mubr.msk.bf16.mxu0 %vm1213_vm1, %v1212_v15  ;;  %v883_v15 = vld [vmem:[%s1552_s5 + $0x2] ss:$0 sm:$0xff] }
 0x51f   : > { %v1044_v21 = vpop.eup %1043 }
 0x520   : > { %v601_v22 = vmul.f32 %v1044_v21, %v1040_v11 }
 0x522   : > { %v602_v23 = vpack.c.bf16 %v601_v22, %v601_v22 }
 0x524   : > { %939 = vmatmul.mubr.msk.bf16.vlgmr.msra.gmra.mrb[8].mxu0 %vm470_vm4, %v602_v23 }
 0x5ef   : > { %v526_v25 = vpop.f32.mrb[4].mxu0 }
 0x5f0   : > { %v532_v27 = vpack.c.bf16 %v526_v25, %v526_v25  ;;  %v928_v28 = vpop.f32.mrb[5].mxu0 }
 0x5f1   : > { %v529_v29 = vpop.f32.mrb[6].mxu0 }
 0x5f2   : > { %534 = vst.msk [vmem:[#allocation3] sm:$0xf] %vm533_vm6, %v532_v27  ;;  %v929_v30 = vpop.f32.mrb[7].mxu0 }
 0x5f7   : > { %v645_v31 = vpop.f32.mrb[8].mxu0 }
 0x5f8   : > { %v895_v32 = vpack.c.bf16 %v645_v31, %v645_v31  ;;  %v940_v33 = vpop.f32.mrb[9].mxu0 }
 0x5f9   : > { %v648_v34 = vpop.f32.mrb[10].mxu0 }
 0x5fa   : > { %655 = vrot.lane.b32.xlu1 %v895_v32, %s1219_s10  ;;  %v941_v35 = vpop.f32.mrb[11].mxu0 }
 0x66c   : > { %v656_v36 = vpop.permute.xlu1 %655 }
 0x66d   : > { %659 = vst.msk [vmem:[#allocation3] sm:$0xf] %vm658_vm7, %v656_v36 }
 0x674   : > { %v660_v37 = vld [vmem:[#allocation3] sm:$0xf] }
 0x675   : > { %947 = vmatmul.mubr.msk.bf16.vlgmr.msra.gmra.mrb[8].mxu1 %vm305_vm0, %v660_v37 }
 0x748   : > { %v722_v38 = vpop.f32.mrb[8].mxu1 }
 0x749   : > { %v723_v39 = vadd.f32 %v883_v15, %v722_v38  ;;  %v948_v40 = vpop.f32.mrb[9].mxu1 }
 0x74a   : > { %v725_v41 = vpop.f32.mrb[10].mxu1 }
 0x74b   : > { %728 = vadd.xlane.f32.xlu1 %v723_v39  ;;  %v949_v42 = vpop.f32.mrb[11].mxu1 }
 0x7d8   : > { %v729_v43 = vpop.xlane.xlu1 %728 }
 0x7d9   : > { %v730_v44 = vmul.f32 0.03125, %v729_v43 }
 0x7db   : > { %v731_v46 = vsub.f32 %v723_v39, %v730_v44 }
 0x7dd   : > { %v736_v47 = vmul.f32 %v887_v45, %v731_v46 }
 0x7df   : > { %v737_v48 = vmul.f32 %v736_v47, %v736_v47 }
 0x7e1   : > { %738 = vadd.xlane.f32.xlu0 %v737_v48 }
 0x86e   : > { %v739_v49 = vpop.xlane.xlu0 %738 }
 0x86f   : > { %v740_v50 = vmul.f32 0.03125, %v739_v49 }
 0x871   : > { %v741_v51 = vadd.f32 1e-05, %v740_v50 }
 0x873   : > { %1045 = vrsqrt.f32 %v741_v51 }
 0x87d   : > { %v1046_v52 = vpop.eup %1045 }
 0x87e   : > { %v743_v54 = vmul.f32 %v1046_v52, %v736_v47 }
 0x880   : > { %v748_v56 = vmul.f32 %v888_v53, %v743_v54 }
 0x882   : > { %v753_v57 = vadd.f32 %v889_v55, %v748_v56 }
 0x884   : > { %v754_v58 = vadd.f32 %v753_v57, %v723_v39 }
 0x886   : > { %755 = vst [vmem:[%s298_s8] sm:$0xff] %v754_v58 }
 0x887   : > { %1146 = shalt.err (!%p1143_p2)
}
 0x888   : > { %s1147_s13 = scalar_lea.hbm %s1503_s19, 128  ;;  %s1151_s17 = scalar_lea.hbm %s1553_s6, 256 }
 0x889   : > { %p1148_p13 = scmp.ne.s32.totalorder %s1503_s19, %s1147_s13  ;;  %p1152_p4 = scmp.lt.u32.totalorder %s1503_s19, %s1553_s6 }
 0x88a   : > { %p1153_p5 = scmp.lt.u32.totalorder %s1151_s17, %s1147_s13  ;;  %p1155_p8 = scmp.lt.u32.totalorder %s1147_s13, %s1503_s19 }
 0x88b   : > { %p1149_p6 = pnand %p1148_p13, %p1567_p0 }
 0x88c   : > { %p1154_p11 = por %p1153_p5, %p1152_p4 }
 0x88d   : > { %p1150_p10 = pneg %p1149_p6 }
 0x88e   : > { %p1156_p1 = por %p1155_p8, %p1154_p11 }
 0x890   : > { %p1157_p3 = pnand %p1156_p1, %p1150_p10 }
 0x892   : > { %1160 = shalt.err (!%p1157_p3)
}
 0x893   : > { %960 = dma.vmem_to_hbm [thread:$0]  (%p1567_p0), %s1505_s18, 128, %s1503_s19, %s757_s12  }
 0x894 PF: > { %s782_s8 = sand.u32 1, %s1191_s21   ;;  %p1568_p7 = scmp.ne.s32.totalorder %s1558_s28, 0 }
 0x895   : > { %p1569_p9 = scmp.ge.s32.totalorder %s1203_s24, 2  ;;  %s783_s30 = scalar_lea.sflag [#allocation6], %s782_s8 }
 0x897   : > { %p974_p12 = pnand %p1569_p9, %p1568_p7 }
 0x899   : > { %1186 = dma.done.wait (!%p974_p12), %s783_s30, 128  }
 0x89a   : > { %1188 = vsyncadd (!%p974_p12), %s783_s30, 4294967168  ;;  %p20_p2 = scmp.ge.s32.totalorder %s1366_s26, 4   ;;  %s1570_s21 = smov %s1195_s22 }
 0x89b   : > { %s1571_s22 = smov %s1199_s23  ;;  %s1572_s23 = smov %s1382_s11 }
 0x89c   : > { %s1573_s24 = smov %s1366_s26  ;;  %22 = sbr.rel (!%p20_p2) target bundleno = 6 (0x6), region = 97 }
 0x8a3   :  { %788 = vsyncpa [#allocation5], 1 }
 0x8a4   :  { %790 = vsyncpa [#allocation5 + $0x1], 1 }
 0x8a5   :  { %791 = vsyncpa [#allocation8], 1 }
 0x8a6   :  { %792 = vsyncpa [#allocation6], 1 }
 0x8a7   :  { %794 = vsyncpa [#allocation6 + $0x1], 1 }

// kernel: tpu_custom_call.1
= control target key start
LH: loop header
LB: loop body
LE: loop exit
PB: predicated region body
PF: predicated region fallthrough
CT: control target
= control target key end

     0   :  { %11 = vsyncpa [#allocation5], 0  ;;  %s1547_s0 = inlined_call_operand.hbm [shape: f32[32,32], index: 0, kind: input, shape index: {}]   ;;  %s1548_s1 = inlined_call_operand.hbm [shape: bf16[32,96], index: 1, kind: input, shape index: {}]   ;;  %s1549_s2 = inlined_call_operand.hbm [shape: bf16[32,128], index: 2, kind: input, shape index: {}]   ;;  %s1550_s3 = inlined_call_operand.vmem [shape: f32[1,96], index: 3, kind: input, shape index: {}]   ;;  %s1551_s4 = inlined_call_operand.vmem [shape: f32[2,32], index: 4, kind: input, shape index: {}]   ;;  %s1552_s5 = inlined_call_operand.vmem [shape: f32[4,128], index: 5, kind: input, shape index: {}]   ;;  %s1553_s6 = inlined_call_operand.hbm [shape: f32[16,128], index: 6, kind: output, shape index: {}]  }
   0x1   :  { %13 = vsyncpa [#allocation5 + $0x1], 0 }
   0x2   :  { %14 = vsyncpa [#allocation8], 0 }
   0x3   :  { %15 = vsyncpa [#allocation6], 0 }
   0x4   :  { %17 = vsyncpa [#allocation6 + $0x1], 0  ;;  %s1256_s21 = smov 0   ;;  %s1258_s22 = smov 0  }
   0x5   :  { %s1260_s23 = smov 0   ;;  %s1262_s24 = smov 0  }
   0x6 LB: > { %s1277_s25 = sadd.s32 4294967295, %s1203_s24   ;;  %s859_s26 = sadd.s32 4294967294, %s1203_s24   ;;  %s1203_s24 = sphi %s1262_s24, %s1573_s24   ;;  %s1199_s23 = sphi %s1260_s23, %s1572_s23   ;;  %s1195_s22 = sphi %s1258_s22, %s1571_s22   ;;  %s1191_s21 = sphi %s1256_s21, %s1570_s21  }
   0x7   : > { %p43_p0 = scmp.ne.s32.totalorder %s1195_s22, %s1191_s21  ;;  %p1554_p1 = scmp.eq.s32.totalorder %s1277_s25, 0 }
   0x8   : > { %p178_p3 = scmp.eq.s32.totalorder %s859_s26, 1  ;;  %p860_p5 = scmp.ge.s32.totalorder %s1203_s24, 1 }
   0x9   : > { %p1286_p4 = por %p1554_p1, %p43_p0  ;;  %p185_p7 = scmp.lt.s32.totalorder %s1203_s24, 3 }
   0xa   : > { %p1291_p6 = por %p178_p3, %p43_p0  ;;  %s1205_s30 = smov [#allocation7]  }
   0xb   : > { %s1557_s27 = scalar_select %p1286_p4, 1, 0 }
   0xc   : > { %s1558_s28 = scalar_select %p1291_p6, 1, 0 }
   0xd   : > { %p1296_p8 = pnand %p860_p5, %p185_p7  ;;  %s197_s7 = sshll.u32 %s1205_s30, 4  ;;  %s1300_s7 = int_to_ptr.vmem [resolvable:$true] %s197_s7 }
   0xe   : > { %s1206_s9 = smov [#allocation9]   ;;  %s1047_s13 = scalar_lea.hbm %s1548_s1, 256 }
   0xf   : > { %p962_p9 = pneg %p1296_p8  ;;  %s210_s10 = sshll.u32 %s1206_s9, 4  ;;  %s1311_s10 = int_to_ptr.vmem [resolvable:$true] %s210_s10 }
  0x10   : > { %p1048_p12 = scmp.ne.s32.totalorder %s1548_s1, %s1047_s13  ;;  %p1054_p5 = scmp.lt.u32.totalorder %s1047_s13, %s1548_s1 }
  0x11   : > { %p1307_p11 = pnand %p962_p9, %p1554_p1 }
  0x13   : > { %p1049_p13 = pneg %p1307_p11 }
  0x15   : > { %p1050_p0 = pnand %p1049_p13, %p1048_p12 }
  0x17   : > { %p1051_p3 = pneg %p1050_p0 }
  0x19   : > { %p1056_p7 = pnand %p1054_p5, %p1051_p3 }
  0x1b   : > { %1059 = shalt.err (!%p1056_p7)
}
  0x1c   : > { %s1060_s18 = scalar_lea.vmem %s1300_s7, 256  ;;  %p1068_p2 = scmp.lt.s32.totalorder %s1300_s7, %s1300_s7 }
  0x1d   : > { %p1061_p9 = scmp.ne.s32.totalorder %s1300_s7, %s1060_s18  ;;  %p1069_p12 = scmp.lt.s32.totalorder %s1060_s18, %s1060_s18 }
  0x1f   : > { %p1063_p10 = pnand %p1061_p9, %p1049_p13  ;;  %p1070_p0 = por %p1069_p12, %p1068_p2 }
  0x21   : > { %p1064_p1 = pneg %p1063_p10 }
  0x23   : > { %p1071_p6 = pnand %p1070_p0, %p1064_p1 }
  0x25   : > { %1074 = shalt.err (!%p1071_p6)
}
  0x26   : > { %s1207_s19 = smov 64   ;;  %s1208_s20 = smov 4  }
  0x27   : > { %965 = dma.hbm_to_vmem [thread:$0]  (!%p1307_p11), %s1548_s1, 256, %s1300_s7, [#allocation8], %s1207_s19, %s1207_s19, %s1208_s20  }
  0x28   : > { %s1075_s12 = scalar_lea.hbm %s1549_s2, 256 }
  0x29   : > { %p1076_p2 = scmp.ne.s32.totalorder %s1549_s2, %s1075_s12  ;;  %p1082_p10 = scmp.lt.u32.totalorder %s1075_s12, %s1549_s2 }
  0x2b   : > { %p1078_p1 = pnand %p1076_p2, %p1049_p13 }
  0x2d   : > { %p1079_p6 = pneg %p1078_p1 }
  0x2f   : > { %p1084_p3 = pnand %p1082_p10, %p1079_p6 }
  0x31   : > { %1087 = shalt.err (!%p1084_p3)
}
  0x32   : > { %s1088_s7 = scalar_lea.vmem %s1311_s10, 256  ;;  %p1096_p12 = scmp.lt.s32.totalorder %s1311_s10, %s1311_s10 }
  0x33   : > { %p1089_p5 = scmp.ne.s32.totalorder %s1311_s10, %s1088_s7  ;;  %p1097_p0 = scmp.lt.s32.totalorder %s1088_s7, %s1088_s7 }
  0x35   : > { %p1091_p7 = pnand %p1089_p5, %p1049_p13  ;;  %p1098_p2 = por %p1097_p0, %p1096_p12 }
  0x37   : > { %p1092_p9 = pneg %p1091_p7 }
  0x39   : > { %p1099_p1 = pnand %p1098_p2, %p1092_p9 }
  0x3b   : > { %1102 = shalt.err (!%p1099_p1)
}
  0x3c   : > { %968 = dma.hbm_to_vmem [thread:$0]  (!%p1307_p11), %s1549_s2, 256, %s1311_s10, [#allocation8], %s1207_s19, %s1207_s19, %s1208_s20  }
  0x3d   : > { %s1366_s26 = sadd.s32 1, %s1203_s24   ;;  %s30_s8 = sadd.s32 1, %s1199_s23 }
  0x3e   : > { %s27_s30 = ssub.s32 %s1203_s24, %s1366_s26  ;;  %p37_p13 = scmp.ne.s32.totalorder %s1199_s23, %s1195_s22 }
  0x3f   : > { %p28_p6 = scmp.eq.s32.totalorder %s27_s30, 0  ;;  %p38_p10 = scmp.eq.s32.totalorder %s1203_s24, 0 }
  0x40   : > { %p1561_p3 = scmp.eq.s32.totalorder %s1277_s25, 1  ;;  %p979_p7 = scmp.lt.s32.totalorder %s1203_s24, 2 }
  0x41   : > { %s1382_s11 = scalar_select %p28_p6, %s1199_s23, %s30_s8  }
  0x42   : > { %p1376_p5 = por %p1561_p3, %p37_p13  ;;  %p39_p9 = por %p38_p10, %p37_p13 }
  0x43   : > { %s233_s12 = sand.u32 1, %s1199_s23   ;;  %s894_s10 = sshll.u32 %s1203_s24, 8 }
  0x44   : > { %s1562_s9 = scalar_select %p1376_p5, 1, 0 }
  0x45   : > { %s864_s13 = sshll.u32 %s233_s12, 4  ;;  %s1389_s14 = scalar_lea.hbm %s1547_s0, %s894_s10 }
  0x46   : > { %s237_s15 = scalar_lea.vmem [#allocation4], %s864_s13  ;;  %p1393_p11 = pnand %p979_p7, %p39_p9 }
  0x47   : > { %s244_s16 = sshll.u32 %s237_s15, 4  ;;  %s1397_s17 = scalar_lea.sflag [#allocation5], %s233_s12  ;;  %s1391_s16 = int_to_ptr.vmem [resolvable:$true] %s244_s16 }
  0x48   : > { %s1103_s18 = scalar_lea.hbm %s1389_s14, 256  ;;  %p1105_p0 = pneg %p1393_p11 }
  0x49   : > { %p1104_p12 = scmp.ne.s32.totalorder %s1389_s14, %s1103_s18  ;;  %s1108_s13 = scalar_lea.hbm %s1547_s0, 512 }
  0x4a   : > { %p1109_p13 = scmp.lt.u32.totalorder %s1389_s14, %s1547_s0  ;;  %p1110_p6 = scmp.lt.u32.totalorder %s1108_s13, %s1103_s18 }
  0x4b   : > { %p1106_p2 = pnand %p1105_p0, %p1104_p12  ;;  %p1112_p3 = scmp.lt.u32.totalorder %s1103_s18, %s1389_s14 }
  0x4c   : > { %p1111_p10 = por %p1110_p6, %p1109_p13 }
  0x4d   : > { %p1107_p1 = pneg %p1106_p2 }
  0x4e   : > { %p1113_p7 = por %p1112_p3, %p1111_p10 }
  0x50   : > { %p1114_p9 = pnand %p1113_p7, %p1107_p1 }
  0x52   : > { %1117 = shalt.err (!%p1114_p9)
}
  0x53   : > { %s1118_s12 = scalar_lea.vmem %s1391_s16, 256  ;;  %s1209_s20 = smov [#allocation4]  }
  0x54   : > { %p1119_p12 = scmp.ne.s32.totalorder %s1391_s16, %s1118_s12  ;;  %s1123_s15 = sshll.u32 %s1209_s20, 4  ;;  %s1124_s15 = int_to_ptr.vmem [resolvable:$false] %s1123_s15 }
  0x55   : > { %s1125_s8 = scalar_lea.vmem %s1124_s15, 512  ;;  %p1126_p4 = scmp.lt.s32.totalorder %s1391_s16, %s1124_s15 }
  0x56   : > { %p1121_p2 = pnand %p1119_p12, %p1105_p0  ;;  %p1127_p13 = scmp.lt.s32.totalorder %s1125_s8, %s1118_s12 }
  0x58   : > { %p1122_p5 = pneg %p1121_p2  ;;  %p1128_p6 = por %p1127_p13, %p1126_p4 }
  0x5a   : > { %p1129_p10 = pnand %p1128_p6, %p1122_p5 }
  0x5c   : > { %1132 = shalt.err (!%p1129_p10)
}
  0x5d   : > { %s1210_s18 = smov 128   ;;  %s1211_s30 = smov 8  }
  0x5e   : > { %972 = dma.hbm_to_vmem [thread:$0]  (!%p1393_p11), %s1389_s14, 256, %s1391_s16, %s1397_s17, %s1210_s18, %s1210_s18, %s1211_s30  }
  0x5f   : > { %256 = sbr.rel (%p1296_p8) target bundleno = 2196 (0x894), region = 44  ;;  %s1428_s13 = sand.u32 (!%p1296_p8), 1, %s1195_s22  }
  0x60   : > { %s868_s10 = sshll.u32 (!%p1296_p8), %s1428_s13, 4  ;;  %s259_s19 = scalar_lea.sflag (!%p1296_p8), [#allocation5], %s1428_s13 }
  0x61   : > { %s262_s12 = scalar_lea.vmem (!%p1296_p8), [#allocation4], %s868_s10  ;;  %p1564_p4 = scmp.ne.s32.totalorder (!%p1296_p8), %s1557_s27, 0 }
  0x66   : > { %1178 = dma.done.wait (%p1564_p4), %s259_s19, 256  }
  0x67   : > { %1180 = vsyncadd (%p1564_p4), %s259_s19, 4294967040  ;;  %p1565_p5 = scmp.eq.s32.totalorder %s1277_s25, 0 }
  0x69   : > { %1182 = dma.done.wait (%p1565_p5), [#allocation8], 512   ;;  %p1566_p11 = pmov %p1565_p5 }
  0x6a   : > { %vm305_vm0 = vcmask 261120   ;;  %v303_v0 = vld [vmem:[%s262_s12] sm:$0xff]  ;;  %v304_v1 = vld [vmem:[%s262_s12 + $0x8] sm:$0xff]  ;;  %v1212_v15 = vmov 0.0   ;;  %vm1213_vm1 = vmmov 0   ;;  %vm414_vm2 = vcmask 785408  }
  0x6b   : > { %1184 = vsyncadd (%p1566_p11), [#allocation8], 4294966784  ;;  %v306_v2 = vsel %vm305_vm0, %v303_v0, 0.0  ;;  %v309_v3 = vsel %vm305_vm0, %v304_v1, 0.0  ;;  %v1029_v14 = vld [vmem:[#allocation7] sm:$0xff]   ;;  %910 = vmatprep.subr.bf16.mxu0 %v1212_v15  ;;  %918 = vmatprep.subr.bf16.mxu1 %v1212_v15  ;;  %v1030_v16 = vld [vmem:[#allocation7 + $0x8] sm:$0xff]  }
  0x6c   : > { %307 = vadd.xlane.f32.xlu0 %v306_v2  ;;  %911 = vmatpush3.bf16.msra.mxu0 %v1029_v14  ;;  %v872_v25 = vld [vmem:[%s1551_s4] ss:$0 sm:$0xff]  ;;  %v873_v29 = vld [vmem:[%s1551_s4 + $0x1] ss:$0 sm:$0xff]  ;;  %s1214_s20 = smov 80   ;;  %s1215_s15 = smov 96  }
  0x6d   : > { %914 = vmatprep.mubr.msk.bf16.mxu0 %vm1213_vm1, %v1212_v15  ;;  %912 = vmatprep.subr.bf16.mxu0 %v1212_v15  ;;  %v874_v34 = vld [vmem:[%s1550_s3] ss:$0 sm:$0xff]  ;;  %s1216_s8 = smov 112   ;;  %vm422_vm3 = vcmask 130048   ;;  %vm470_vm4 = vcmask 64512   ;;  %s1217_s18 = smov 64  }
  0x6e   : > { %920 = vmatprep.mubr.msk.bf16.mxu1 %vm1213_vm1, %v1212_v15  ;;  %vm488_vm5 = vcmask 1043456   ;;  %s1218_s30 = smov 48   ;;  %vm533_vm6 = vcmask 125952   ;;  %s1219_s10 = smov 16   ;;  %vm658_vm7 = vcmask 257152  }
  0x6f   : > { %s871_s14 = sshll.u32 %s1428_s13, 3  ;;  %s757_s12 = scalar_lea.sflag [#allocation6], %s1428_s13 }
  0x70   : > { %310 = vadd.xlane.f32.xlu0 %v309_v3  ;;  %913 = vmatpush3.bf16.msra.mxu0 %v1030_v16  ;;  %p1567_p0 = scmp.ne.s32.totalorder %s1562_s9, 0 }
  0x71   : > { %924 = vmatprep.subr.bf16.mxu0 %v1212_v15 }
  0xf9   : > { %v308_v4 = vpop.xlane.xlu0 %307 }
  0xfa   : > { %v313_v5 = vmul.f32 0.03125, %v308_v4 }
  0xfc   : > { %v315_v6 = vsub.f32 %v303_v0, %v313_v5 }
  0xfd   : > { %v311_v7 = vpop.xlane.xlu0 %310 }
  0xfe   : > { %v314_v8 = vmul.f32 0.03125, %v311_v7  ;;  %v317_v9 = vmul.f32 %v315_v6, %v315_v6 }
 0x100   : > { %v316_v10 = vsub.f32 %v304_v1, %v314_v8  ;;  %v319_v11 = vsel %vm305_vm0, %v317_v9, 0.0 }
 0x101   : > { %320 = vadd.xlane.f32.xlu1 %v319_v11 }
 0x102   : > { %v318_v12 = vmul.f32 %v316_v10, %v316_v10 }
 0x104   : > { %v322_v13 = vsel %vm305_vm0, %v318_v12, 0.0 }
 0x105   : > { %323 = vadd.xlane.f32.xlu1 %v322_v13 }
 0x18e   : > { %v321_v17 = vpop.xlane.xlu1 %320 }
 0x18f   : > { %v325_v18 = vmul.f32 0.03125, %v321_v17 }
 0x191   : > { %v327_v19 = vadd.f32 1e-05, %v325_v18 }
 0x192   : > { %v324_v20 = vpop.xlane.xlu1 %323 }
 0x193   : > { %1033 = vrsqrt.f32 %v327_v19  ;;  %v326_v21 = vmul.f32 0.03125, %v324_v20 }
 0x195   : > { %v328_v22 = vadd.f32 1e-05, %v326_v21 }
 0x197   : > { %1035 = vrsqrt.f32 %v328_v22 }
 0x19d   : > { %v1034_v23 = vpop.eup %1033 }
 0x19e   : > { %v331_v24 = vmul.f32 %v1034_v23, %v315_v6 }
 0x1a0   : > { %v337_v28 = vmul.f32 %v872_v25, %v331_v24  ;;  %v1031_v24 = vld [vmem:[#allocation9] sm:$0xff]  }
 0x1a1   : > { %v1036_v26 = vpop.eup %1035 }
 0x1a2   : > { %v332_v27 = vmul.f32 %v1036_v26, %v316_v10  ;;  %v343_v31 = vadd.f32 %v873_v29, %v337_v28  ;;  %v1032_v26 = vld [vmem:[#allocation9 + $0x8] sm:$0xff]  }
 0x1a4   : > { %v338_v30 = vmul.f32 %v872_v25, %v332_v27 }
 0x1a6   : > { %v344_v32 = vadd.f32 %v873_v29, %v338_v30 }
 0x1a8   : > { %v345_v33 = vpack.c.bf16 %v344_v32, %v343_v31 }
 0x1aa   : > { %915 = vmatmul.mubr.msk.bf16.vlgmr.msra.gmra.mrb[0].mxu0 %vm305_vm0, %v345_v33 }
 0x1ab   : > { %926 = vmatprep.mubr.msk.bf16.mxu0 %vm1213_vm1, %v1212_v15 }
 0x27d   : > { %v406_v35 = vpop.f32.mrb[0].mxu0 }
 0x27e   : > { %v916_v36 = vpop.f32.mrb[1].mxu0  ;;  %v407_v38 = vadd.f32 %v874_v34, %v406_v35 }
 0x27f   : > { %v409_v37 = vpop.f32.mrb[2].mxu0 }
 0x280   : > { %v410_v39 = vadd.f32 %v874_v34, %v409_v37  ;;  %v917_v40 = vpop.f32.mrb[3].mxu0 }
 0x282   : > { %v413_v41 = vpack.c.bf16 %v410_v39, %v407_v38 }
 0x284   : > { %415 = vst.msk [vmem:[#allocation2] sm:$0xff] %vm414_vm2, %v413_v41 }
 0x28b   : > { %v1464_v42 = vld [vmem:[#allocation2] sm:$0xf0]  ;;  %v535_v46 = vld [vmem:[#allocation2] sm:$0xf] }
 0x28c   : > { %v417_v43 = vld [vmem:[#allocation2] sm:$0xf0]  ;;  %v541_v44 = vrot.slane %v1464_v42, 4  ;;  %v416_v50 = vld [vmem:[#allocation2] sm:$0xf] }
 0x28d   : > { %v419_v45 = vrot.slane %v417_v43, 4 }
 0x28e   : > { %542 = vrot.lane.b32.xlu1 %v541_v44, %s1214_s20 }
 0x28f   : > { %420 = vrot.lane.b32.xlu0 %v419_v45, %s1215_s15  ;;  %s891_s15 = sshll.u32 %s1277_s25, 7  ;;  %s1220_s25 = smov [#allocation10]  }
 0x290   : > { %s1503_s19 = scalar_lea.hbm %s1553_s6, %s891_s15  ;;  %s1137_s29 = sshll.u32 %s1220_s25, 4  ;;  %s1138_s29 = int_to_ptr.vmem [resolvable:$false] %s1137_s29 }
 0x292   : > { %538 = vrot.lane.b32.xlu1 %v535_v46, %s1216_s8  ;;  %s298_s8 = scalar_lea.vmem [#allocation10], %s871_s14  ;;  %s1139_s14 = scalar_lea.vmem %s1138_s29, 256 }
 0x300   : > { %v543_v49 = vpop.permute.xlu1 %542 }
 0x301   : > { %v421_v47 = vpop.permute.xlu0 %420  ;;  %v548_v51 = vsel %vm422_vm3, %v543_v49, 0 }
 0x302   : > { %v427_v48 = vsel %vm422_vm3, %v421_v47, 0 }
 0x303   : > { %919 = vmatpush3.bf16.xpose.msra.mxu1 %v427_v48 }
 0x304   : > { %930 = vmatprep.subr.bf16.mxu1 %v1212_v15  ;;  %v539_v52 = vpop.permute.xlu1 %538 }
 0x30a   : > { %921 = vmatmul.mubr.msk.bf16.vlgmr.msra.gmra.mrb[0].mxu1 %vm422_vm3, %v416_v50 }
 0x30b   : > { %931 = vmatpush3.bf16.xpose.msra.mxu1 %v548_v51  ;;  %932 = vmatprep.mubr.msk.bf16.mxu1 %vm1213_vm1, %v1212_v15 }
 0x30c   : > { %942 = vmatprep.subr.bf16.mxu1 %v1212_v15 }
 0x312   : > { %933 = vmatmul.mubr.msk.bf16.vlgmr.msra.gmra.mrb[4].mxu1 %vm422_vm3, %v539_v52 }
 0x313   : > { %946 = vmatprep.mubr.msk.bf16.mxu1 %vm1213_vm1, %v1212_v15  ;;  %943 = vmatpush3.bf16.msra.mxu1 %v1031_v24 }
 0x314   : > { %944 = vmatprep.subr.bf16.mxu1 %v1212_v15 }
 0x317   : > { %945 = vmatpush3.bf16.msra.mxu1 %v1032_v26 }
 0x3dd   : > { %v463_v53 = vpop.f32.mrb[0].mxu1 }
 0x3de   : > { %v469_v54 = vmul.f32 0.25, %v463_v53  ;;  %v922_v55 = vpop.f32.mrb[1].mxu1  ;;  %v888_v53 = vld [vmem:[%s1552_s5] ss:$0 sm:$0xff] }
 0x3df   : > { %v466_v56 = vpop.f32.mrb[2].mxu1  ;;  %v889_v55 = vld [vmem:[%s1552_s5 + $0x1] ss:$0 sm:$0xff] }
 0x3e0   : > { %v923_v57 = vpop.f32.mrb[3].mxu1  ;;  %v471_v58 = vsel %vm470_vm4, %v469_v54, -inf }
 0x3e1   : > { %472 = vmax.xlane.f32.xlu1 %v471_v58 }
 0x3e5   : > { %v584_v59 = vpop.f32.mrb[4].mxu1 }
 0x3e6   : > { %v590_v60 = vmul.f32 0.25, %v584_v59  ;;  %v934_v61 = vpop.f32.mrb[5].mxu1 }
 0x3e7   : > { %v587_v62 = vpop.f32.mrb[6].mxu1 }
 0x3e8   : > { %v935_v63 = vpop.f32.mrb[7].mxu1  ;;  %v591_v0 = vsel %vm470_vm4, %v590_v60, -inf }
 0x3e9   : > { %592 = vmax.xlane.f32.xlu0 %v591_v0 }
 0x3f2   : > { %483 = vrot.lane.b32.xlu1 %v419_v45, %s1217_s18  ;;  %v887_v45 = vld [vmem:[%s1552_s5 + $0x3] ss:$0 sm:$0xff]  ;;  %s770_s18 = sshll.u32 %s298_s8, 4  ;;  %s1505_s18 = int_to_ptr.vmem [resolvable:$true] %s770_s18 }
 0x3f3   : > { %s1133_s27 = scalar_lea.vmem %s1505_s18, 128  ;;  %p1140_p7 = scmp.lt.s32.totalorder %s1505_s18, %s1138_s29 }
 0x3f4   : > { %p1134_p8 = scmp.ne.s32.totalorder %s1505_s18, %s1133_s27  ;;  %p1141_p9 = scmp.lt.s32.totalorder %s1139_s14, %s1133_s27 }
 0x3f6   : > { %p1135_p1 = pnand %p1134_p8, %p1567_p0  ;;  %p1142_p12 = por %p1141_p9, %p1140_p7 }
 0x3f8   : > { %p1136_p3 = pneg %p1135_p1 }
 0x3fa   : > { %p1143_p2 = pnand %p1142_p12, %p1136_p3 }
 0x46e   : > { %v473_v1 = vpop.xlane.xlu1 %472 }
 0x46f   : > { %v474_v2 = vsub.f32 %v469_v54, %v473_v1 }
 0x471   : > { %v475_v3 = vmul.f32 1.442695, %v474_v2 }
 0x472   : > { %v484_v4 = vpop.permute.xlu1 %483 }
 0x473   : > { %1037 = vpow2.f32 %v475_v3  ;;  %v490_v5 = vsel %vm488_vm5, %v484_v4, 0 }
 0x474   : > { %925 = vmatpush3.bf16.msra.mxu0 %v490_v5 }
 0x475   : > { %936 = vmatprep.subr.bf16.mxu0 %v1212_v15 }
 0x476   : > { %v593_v6 = vpop.xlane.xlu0 %592 }
 0x477   : > { %v594_v7 = vsub.f32 %v590_v60, %v593_v6 }
 0x479   : > { %v595_v8 = vmul.f32 1.442695, %v594_v7 }
 0x47b   : > { %1039 = vpow2.f32 %v595_v8 }
 0x47d   : > { %v1038_v9 = vpop.eup %1037 }
 0x47e   : > { %v477_v10 = vsel %vm470_vm4, %v1038_v9, 0.0 }
 0x47f   : > { %478 = vadd.xlane.f32.xlu0 %v477_v10 }
 0x485   : > { %v1040_v11 = vpop.eup %1039 }
 0x486   : > { %v597_v12 = vsel %vm470_vm4, %v1040_v11, 0.0 }
 0x487   : > { %598 = vadd.xlane.f32.xlu0 %v597_v12 }
 0x49d   : > { %603 = vrot.lane.b32.xlu0 %v541_v44, %s1218_s30 }
 0x50c   : > { %v479_v13 = vpop.xlane.xlu0 %478 }
 0x50d   : > { %1041 = vrcp.f32 %v479_v13 }
 0x514   : > { %v599_v14 = vpop.xlane.xlu0 %598 }
 0x515   : > { %1043 = vrcp.f32 %v599_v14 }
 0x517   : > { %v1042_v16 = vpop.eup %1041 }
 0x518   : > { %v481_v17 = vmul.f32 %v1042_v16, %v1038_v9  ;;  %v604_v18 = vpop.permute.xlu0 %603 }
 0x519   : > { %v609_v20 = vsel %vm488_vm5, %v604_v18, 0 }
 0x51a   : > { %v482_v19 = vpack.c.bf16 %v481_v17, %v481_v17 }
 0x51c   : > { %927 = vmatmul.mubr.msk.bf16.vlgmr.msra.gmra.mrb[4].mxu0 %vm470_vm4, %v482_v19 }
 0x51d   : > { %937 = vmatpush3.bf16.msra.mxu0 %v609_v20  ;;  %938 = vmatprep.mubr.msk.bf16.mxu0 %vm1213_vm1, %v1212_v15  ;;  %v883_v15 = vld [vmem:[%s1552_s5 + $0x2] ss:$0 sm:$0xff] }
 0x51f   : > { %v1044_v21 = vpop.eup %1043 }
 0x520   : > { %v601_v22 = vmul.f32 %v1044_v21, %v1040_v11 }
 0x522   : > { %v602_v23 = vpack.c.bf16 %v601_v22, %v601_v22 }
 0x524   : > { %939 = vmatmul.mubr.msk.bf16.vlgmr.msra.gmra.mrb[8].mxu0 %vm470_vm4, %v602_v23 }
 0x5ef   : > { %v526_v25 = vpop.f32.mrb[4].mxu0 }
 0x5f0   : > { %v532_v27 = vpack.c.bf16 %v526_v25, %v526_v25  ;;  %v928_v28 = vpop.f32.mrb[5].mxu0 }
 0x5f1   : > { %v529_v29 = vpop.f32.mrb[6].mxu0 }
 0x5f2   : > { %534 = vst.msk [vmem:[#allocation3] sm:$0xf] %vm533_vm6, %v532_v27  ;;  %v929_v30 = vpop.f32.mrb[7].mxu0 }
 0x5f7   : > { %v645_v31 = vpop.f32.mrb[8].mxu0 }
 0x5f8   : > { %v895_v32 = vpack.c.bf16 %v645_v31, %v645_v31  ;;  %v940_v33 = vpop.f32.mrb[9].mxu0 }
 0x5f9   : > { %v648_v34 = vpop.f32.mrb[10].mxu0 }
 0x5fa   : > { %655 = vrot.lane.b32.xlu1 %v895_v32, %s1219_s10  ;;  %v941_v35 = vpop.f32.mrb[11].mxu0 }
 0x66c   : > { %v656_v36 = vpop.permute.xlu1 %655 }
 0x66d   : > { %659 = vst.msk [vmem:[#allocation3] sm:$0xf] %vm658_vm7, %v656_v36 }
 0x674   : > { %v660_v37 = vld [vmem:[#allocation3] sm:$0xf] }
 0x675   : > { %947 = vmatmul.mubr.msk.bf16.vlgmr.msra.gmra.mrb[8].mxu1 %vm305_vm0, %v660_v37 }
 0x748   : > { %v722_v38 = vpop.f32.mrb[8].mxu1 }
 0x749   : > { %v723_v39 = vadd.f32 %v883_v15, %v722_v38  ;;  %v948_v40 = vpop.f32.mrb[9].mxu1 }
 0x74a   : > { %v725_v41 = vpop.f32.mrb[10].mxu1 }
 0x74b   : > { %728 = vadd.xlane.f32.xlu1 %v723_v39  ;;  %v949_v42 = vpop.f32.mrb[11].mxu1 }
 0x7d8   : > { %v729_v43 = vpop.xlane.xlu1 %728 }
 0x7d9   : > { %v730_v44 = vmul.f32 0.03125, %v729_v43 }
 0x7db   : > { %v731_v46 = vsub.f32 %v723_v39, %v730_v44 }
 0x7dd   : > { %v736_v47 = vmul.f32 %v887_v45, %v731_v46 }
 0x7df   : > { %v737_v48 = vmul.f32 %v736_v47, %v736_v47 }
 0x7e1   : > { %738 = vadd.xlane.f32.xlu0 %v737_v48 }
 0x86e   : > { %v739_v49 = vpop.xlane.xlu0 %738 }
 0x86f   : > { %v740_v50 = vmul.f32 0.03125, %v739_v49 }
 0x871   : > { %v741_v51 = vadd.f32 1e-05, %v740_v50 }
 0x873   : > { %1045 = vrsqrt.f32 %v741_v51 }
 0x87d   : > { %v1046_v52 = vpop.eup %1045 }
 0x87e   : > { %v743_v54 = vmul.f32 %v1046_v52, %v736_v47 }
 0x880   : > { %v748_v56 = vmul.f32 %v888_v53, %v743_v54 }
 0x882   : > { %v753_v57 = vadd.f32 %v889_v55, %v748_v56 }
 0x884   : > { %v754_v58 = vadd.f32 %v753_v57, %v723_v39 }
 0x886   : > { %755 = vst [vmem:[%s298_s8] sm:$0xff] %v754_v58 }
 0x887   : > { %1146 = shalt.err (!%p1143_p2)
}
 0x888   : > { %s1147_s13 = scalar_lea.hbm %s1503_s19, 128  ;;  %s1151_s17 = scalar_lea.hbm %s1553_s6, 256 }
 0x889   : > { %p1148_p13 = scmp.ne.s32.totalorder %s1503_s19, %s1147_s13  ;;  %p1152_p4 = scmp.lt.u32.totalorder %s1503_s19, %s1553_s6 }
 0x88a   : > { %p1153_p5 = scmp.lt.u32.totalorder %s1151_s17, %s1147_s13  ;;  %p1155_p8 = scmp.lt.u32.totalorder %s1147_s13, %s1503_s19 }
 0x88b   : > { %p1149_p6 = pnand %p1148_p13, %p1567_p0 }
 0x88c   : > { %p1154_p11 = por %p1153_p5, %p1152_p4 }
 0x88d   : > { %p1150_p10 = pneg %p1149_p6 }
 0x88e   : > { %p1156_p1 = por %p1155_p8, %p1154_p11 }
 0x890   : > { %p1157_p3 = pnand %p1156_p1, %p1150_p10 }
 0x892   : > { %1160 = shalt.err (!%p1157_p3)
}
 0x893   : > { %960 = dma.vmem_to_hbm [thread:$0]  (%p1567_p0), %s1505_s18, 128, %s1503_s19, %s757_s12  }
 0x894 PF: > { %s782_s8 = sand.u32 1, %s1191_s21   ;;  %p1568_p7 = scmp.ne.s32.totalorder %s1558_s28, 0 }
 0x895   : > { %p1569_p9 = scmp.ge.s32.totalorder %s1203_s24, 2  ;;  %s783_s30 = scalar_lea.sflag [#allocation6], %s782_s8 }
 0x897   : > { %p974_p12 = pnand %p1569_p9, %p1568_p7 }
 0x899   : > { %1186 = dma.done.wait (!%p974_p12), %s783_s30, 128  }
 0x89a   : > { %1188 = vsyncadd (!%p974_p12), %s783_s30, 4294967168  ;;  %p20_p2 = scmp.ge.s32.totalorder %s1366_s26, 4   ;;  %s1570_s21 = smov %s1195_s22 }
 0x89b   : > { %s1571_s22 = smov %s1199_s23  ;;  %s1572_s23 = smov %s1382_s11 }
 0x89c   : > { %s1573_s24 = smov %s1366_s26  ;;  %22 = sbr.rel (!%p20_p2) target bundleno = 6 (0x6), region = 97 }
 0x8a3   :  { %788 = vsyncpa [#allocation5], 1 }
 0x8a4   :  { %790 = vsyncpa [#allocation5 + $0x1], 1 }
 0x8a5   :  { %791 = vsyncpa [#allocation8], 1 }
 0x8a6   :  { %792 = vsyncpa [#allocation6], 1 }
 0x8a7   :  { %794 = vsyncpa [#allocation6 + $0x1], 1 }

</bundles_post_ra>
